<compile_context>
chip_gen: v5e
topology: v5e:2x2
jax: 0.10.0
libtpu: 0.0.40
codegen_flags: <defaults>
</compile_context>

<pallas_src>
import jax
import jax.numpy as jnp
from jax.experimental import pallas as pl
from jax.experimental.pallas import tpu as pltpu

LANES = 128  # TPU lane width; pad output-channel dims to a multiple of this.


# ----------------------------------------------------------------------------
# Pallas kernels
# ----------------------------------------------------------------------------
def _conv_pool_relu_kernel(p_ref, w_ref, b_ref, o_ref):
    """p_ref: (4, tm, K) bf16 im2col patches for the 4 pooling offsets,
       w_ref: (K, Cp) bf16, b_ref: (1, Cp) f32, o_ref: (tm, Cp) bf16.
       Computes relu(maxpool2x2(conv(x)) + b) for tm pooled output positions
       (bias is constant over the pool window, so max/add commute)."""
    four, tm, k = p_ref.shape
    cp = o_ref.shape[-1]
    p = p_ref[...].reshape(four * tm, k)                  # one big MXU push
    y = jnp.dot(p, w_ref[...], preferred_element_type=jnp.float32)
    y = y.reshape(four, tm, cp)
    pooled = jnp.max(y, axis=0) + b_ref[...]              # fused 2x2 max-pool
    o_ref[...] = jnp.maximum(pooled, 0.0).astype(o_ref.dtype)


def _linear_kernel(x_ref, w_ref, b_ref, o_ref):
    """x_ref: (tm, K) bf16, w_ref: (K, Cp) bf16, b_ref: (1, Cp) f32
       -> o_ref: (tm, Cp) f32."""
    o_ref[...] = (
        jnp.dot(x_ref[...], w_ref[...], preferred_element_type=jnp.float32)
        + b_ref[...]
    ).astype(o_ref.dtype)


# ----------------------------------------------------------------------------
# JAX glue (im2col, padding) + pallas_call wrappers
# ----------------------------------------------------------------------------
def _im2col_nhwc(x, kh, kw):
    """x: (N, H, W, C) -> patches (N, oh, ow, kh*kw*C); valid conv, stride 1."""
    N, H, W, C = x.shape
    oh, ow = H - kh + 1, W - kw + 1
    cols = []
    for ky in range(kh):
        for kx in range(kw):
            cols.append(x[:, ky:ky + oh, kx:kx + ow, :])  # (N, oh, ow, C)
    p = jnp.stack(cols, axis=3)                           # (N, oh, ow, kh*kw, C)
    return p.reshape(N, oh, ow, kh * kw * C), oh, ow


def conv_pool_relu(x, w, b, *, tm=128):
    """relu(maxpool2(conv2d(x, w) + b)); x NHWC (N,H,W,Cin) -> NHWC bf16.
       w is PyTorch layout (Cout, Cin, kh, kw), b is (Cout,)."""
    N, H, W, Cin = x.shape
    Cout, _, kh, kw = w.shape
    K = Cin * kh * kw
    cout_p = ((Cout + LANES - 1) // LANES) * LANES        # lane-dense Cout

    P, oh, ow = _im2col_nhwc(x, kh, kw)                   # (N, oh, ow, K)
    ph, pw = oh // 2, ow // 2
    Mp = N * ph * pw

    # Four pooling-window offsets stacked on a leading axis (bf16 for the MXU).
    offs = [
        P[:, di::2, dj::2, :][:, :ph, :pw, :].reshape(Mp, K)
        for di in range(2) for dj in range(2)
    ]
    Pd = jnp.stack(offs, axis=0).astype(jnp.bfloat16)     # (4, Mp, K)

    # Pad pooled-position rows up to a fixed tile (never whole-array blocks).
    n_tiles = pl.cdiv(Mp, tm)
    Mp_pad = n_tiles * tm
    if Mp_pad != Mp:
        Pd = jnp.pad(Pd, ((0, 0), (0, Mp_pad - Mp), (0, 0)))

    # Weight: (Cout, Cin, kh, kw) -> (kh, kw, Cin, Cout) -> (K, Cout), pad N.
    wf = w.transpose(2, 3, 1, 0).reshape(K, Cout).astype(jnp.bfloat16)
    wf = jnp.pad(wf, ((0, 0), (0, cout_p - Cout)))
    bf = jnp.pad(b.astype(jnp.float32).reshape(1, Cout),
                 ((0, 0), (0, cout_p - Cout)))

    out = pl.pallas_call(
        _conv_pool_relu_kernel,
        out_shape=jax.ShapeDtypeStruct((Mp_pad, cout_p), jnp.bfloat16),
        grid=(n_tiles,),
        in_specs=[
            pl.BlockSpec((4, tm, K), lambda i: (0, i, 0)),
            pl.BlockSpec((K, cout_p), lambda i: (0, 0)),
            pl.BlockSpec((1, cout_p), lambda i: (0, 0)),
        ],
        out_specs=pl.BlockSpec((tm, cout_p), lambda i: (i, 0)),
        compiler_params=pltpu.CompilerParams(
            dimension_semantics=("parallel",)),
    )(Pd, wf, bf)

    # (Mp, Cout) rows are ordered (N, ph, pw) -> NHWC output.
    return out[:Mp, :Cout].reshape(N, ph, pw, Cout)


def linear(x, w, b, *, tm=128):
    """x: (M, K) activations; w: (Cout, K) (columns already in x's flatten
       order); b: (Cout,) -> (M, Cout) f32."""
    M, K = x.shape
    Cout = w.shape[0]
    cout_p = ((Cout + LANES - 1) // LANES) * LANES

    n_tiles = pl.cdiv(M, tm)
    M_pad = n_tiles * tm
    xb = x.astype(jnp.bfloat16)
    if M_pad != M:
        xb = jnp.pad(xb, ((0, M_pad - M), (0, 0)))

    wf = jnp.pad(w.T.astype(jnp.bfloat16), ((0, 0), (0, cout_p - Cout)))
    bf = jnp.pad(b.astype(jnp.float32).reshape(1, Cout),
                 ((0, 0), (0, cout_p - Cout)))

    out = pl.pallas_call(
        _linear_kernel,
        out_shape=jax.ShapeDtypeStruct((M_pad, cout_p), jnp.float32),
        grid=(n_tiles,),
        in_specs=[
            pl.BlockSpec((tm, K), lambda i: (i, 0)),
            pl.BlockSpec((K, cout_p), lambda i: (0, 0)),
            pl.BlockSpec((1, cout_p), lambda i: (0, 0)),
        ],
        out_specs=pl.BlockSpec((tm, cout_p), lambda i: (i, 0)),
        compiler_params=pltpu.CompilerParams(
            dimension_semantics=("parallel",)),
    )(xb, wf, bf)
    return out[:M, :Cout]


# ----------------------------------------------------------------------------
# CNN forward (matches the PyTorch module: conv1->pool->relu, conv2->pool->relu,
# flatten, fc)
# ----------------------------------------------------------------------------
def init_params(key):
    k = jax.random.split(key, 6)

    def u(k_, shape, fan_in):
        bound = 1.0 / jnp.sqrt(float(fan_in))
        return jax.random.uniform(k_, shape, jnp.float32, -bound, bound)

    return {
        "conv1_w": u(k[0], (10, 1, 5, 5), 1 * 5 * 5),
        "conv1_b": u(k[1], (10,), 1 * 5 * 5),
        "conv2_w": u(k[2], (20, 10, 5, 5), 10 * 5 * 5),
        "conv2_b": u(k[3], (20,), 10 * 5 * 5),
        "fc_w":    u(k[4], (10, 320), 320),   # PyTorch layout: (Cout, C*H*W)
        "fc_b":    u(k[5], (10,), 320),
    }


@jax.jit
def cnn_forward(params, x):
    # x: (N, 1, 28, 28) NCHW float32 (PyTorch convention).
    n = x.shape[0]
    x = x.transpose(0, 2, 3, 1)                                   # NHWC once
    x = conv_pool_relu(x, params["conv1_w"], params["conv1_b"])   # (N, 12, 12, 10)
    x = conv_pool_relu(x, params["conv2_w"], params["conv2_b"])   # (N, 4, 4, 20)
    ph, pw, cc = x.shape[1], x.shape[2], x.shape[3]
    x = x.reshape(n, -1)                                          # (N, 320) in H,W,C order
    # Permute fc weight columns from PyTorch's (C,H,W) flatten to (H,W,C).
    fc_w = (params["fc_w"].reshape(-1, cc, ph, pw)
            .transpose(0, 2, 3, 1).reshape(params["fc_w"].shape[0], -1))
    return linear(x, fc_w, params["fc_b"])                        # (N, 10) f32


if __name__ == "__main__":
    key = jax.random.PRNGKey(0)
    params = init_params(key)
    x = jax.random.normal(jax.random.PRNGKey(0), (2, 1, 28, 28), dtype=jnp.float32)

    logits = cnn_forward(params, x)
    jax.block_until_ready(logits)

    assert logits.shape == (2, 10), logits.shape
    assert logits.dtype == jnp.float32
    print("KERNEL_OK")
</pallas_src>

<mosaic_0001>
module attributes {stable_mosaic.version = 11 : i64} {
  func.func @_conv_pool_relu_kernel(%arg0: i32, %arg1: memref<4x128x25xbf16, #tpu.memory_space<vmem>>, %arg2: memref<25x128xbf16, #tpu.memory_space<vmem>>, %arg3: memref<1x128xf32, #tpu.memory_space<vmem>>, %arg4: memref<128x128xbf16, #tpu.memory_space<vmem>>) attributes {dimension_semantics = [#tpu.dimension_semantics<parallel>], iteration_bounds = array<i64: 3>, scalar_prefetch = 0 : i64, scratch_operands = 0 : i64, tpu.core_type = #tpu.core_type<tc>, window_params = [{transform_indices = @transform_0, window_bounds = array<i64: 4, 128, 25>}, {pipeline_mode = #tpu.pipeline_mode<synchronous>, transform_indices = @transform_1, window_bounds = array<i64: 25, 128>}, {pipeline_mode = #tpu.pipeline_mode<synchronous>, transform_indices = @transform_2, window_bounds = array<i64: 1, 128>}, {transform_indices = @transform_3, window_bounds = array<i64: 128, 128>}]} {
    %c0 = arith.constant 0 : index
    %c0_0 = arith.constant 0 : index
    %c0_1 = arith.constant 0 : index
    %0 = vector.load %arg1[%c0, %c0_0, %c0_1] : memref<4x128x25xbf16, #tpu.memory_space<vmem>>, vector<4x128x25xbf16>
    %1 = vector.shape_cast %0 : vector<4x128x25xbf16> to vector<512x25xbf16>
    %c0_2 = arith.constant 0 : index
    %c0_3 = arith.constant 0 : index
    %2 = vector.load %arg2[%c0_2, %c0_3] : memref<25x128xbf16, #tpu.memory_space<vmem>>, vector<25x128xbf16>
    %cst = arith.constant dense<0.000000e+00> : vector<512x128xf32>
    %3 = tpu.matmul %1, %2, %cst {dimension_numbers = #tpu.dot_dimension_numbers<[1], [0], [0], [1], [0, 0, 1, 1], [], []>} : vector<512x25xbf16>, vector<25x128xbf16>, vector<512x128xf32> -> vector<512x128xf32>
    %4 = vector.shape_cast %3 : vector<512x128xf32> to vector<4x128x128xf32>
    %cst_4 = arith.constant dense<0xFF800000> : vector<128x128xf32>
    %5 = vector.multi_reduction <maximumf>, %4, %cst_4 [0] : vector<4x128x128xf32> to vector<128x128xf32>
    %c0_5 = arith.constant 0 : index
    %c0_6 = arith.constant 0 : index
    %6 = vector.load %arg3[%c0_5, %c0_6] : memref<1x128xf32, #tpu.memory_space<vmem>>, vector<1x128xf32>
    %7 = vector.broadcast %6 : vector<1x128xf32> to vector<128x128xf32>
    %8 = arith.addf %5, %7 : vector<128x128xf32>
    %cst_7 = arith.constant 0.000000e+00 : f32
    %9 = vector.broadcast %cst_7 : f32 to vector<128x128xf32>
    %10 = arith.maximumf %8, %9 : vector<128x128xf32>
    %11 = arith.truncf %10 : vector<128x128xf32> to vector<128x128xbf16>
    %c0_8 = arith.constant 0 : index
    %c0_9 = arith.constant 0 : index
    %12 = vector.load %arg4[%c0_8, %c0_9] : memref<128x128xbf16, #tpu.memory_space<vmem>>, vector<128x128xbf16>
    tpu.vector_store %arg4[%c0_8, %c0_9], %11 {strides = array<i32>} : memref<128x128xbf16, #tpu.memory_space<vmem>>, vector<128x128xbf16>,
    return
  }
  func.func @transform_0(%arg0: i32) -> (i32, i32, i32) {
    %c0_i32 = arith.constant 0 : i32
    %c0_i32_0 = arith.constant 0 : i32
    %c0_i32_1 = arith.constant 0 : i32
    return %c0_i32, %arg0, %c0_i32_0 : i32, i32, i32
  }
  func.func @transform_1(%arg0: i32) -> (i32, i32) {
    %c0_i32 = arith.constant 0 : i32
    %c0_i32_0 = arith.constant 0 : i32
    %c0_i32_1 = arith.constant 0 : i32
    return %c0_i32, %c0_i32_0 : i32, i32
  }
  func.func @transform_2(%arg0: i32) -> (i32, i32) {
    %c0_i32 = arith.constant 0 : i32
    %c0_i32_0 = arith.constant 0 : i32
    %c0_i32_1 = arith.constant 0 : i32
    return %c0_i32, %c0_i32_0 : i32, i32
  }
  func.func @transform_3(%arg0: i32) -> (i32, i32) {
    %c0_i32 = arith.constant 0 : i32
    %c0_i32_0 = arith.constant 0 : i32
    return %arg0, %c0_i32 : i32, i32
  }
}

module attributes {stable_mosaic.version = 11 : i64} {
  func.func @_conv_pool_relu_kernel(%arg0: i32, %arg1: memref<4x128x250xbf16, #tpu.memory_space<vmem>>, %arg2: memref<250x128xbf16, #tpu.memory_space<vmem>>, %arg3: memref<1x128xf32, #tpu.memory_space<vmem>>, %arg4: memref<128x128xbf16, #tpu.memory_space<vmem>>) attributes {dimension_semantics = [#tpu.dimension_semantics<parallel>], iteration_bounds = array<i64: 1>, scalar_prefetch = 0 : i64, scratch_operands = 0 : i64, tpu.core_type = #tpu.core_type<tc>, window_params = [{transform_indices = @transform_0, window_bounds = array<i64: 4, 128, 250>}, {pipeline_mode = #tpu.pipeline_mode<synchronous>, transform_indices = @transform_1, window_bounds = array<i64: 250, 128>}, {pipeline_mode = #tpu.pipeline_mode<synchronous>, transform_indices = @transform_2, window_bounds = array<i64: 1, 128>}, {transform_indices = @transform_3, window_bounds = array<i64: 128, 128>}]} {
    %c0 = arith.constant 0 : index
    %c0_0 = arith.constant 0 : index
    %c0_1 = arith.constant 0 : index
    %0 = vector.load %arg1[%c0, %c0_0, %c0_1] : memref<4x128x250xbf16, #tpu.memory_space<vmem>>, vector<4x128x250xbf16>
    %1 = vector.shape_cast %0 : vector<4x128x250xbf16> to vector<512x250xbf16>
    %c0_2 = arith.constant 0 : index
    %c0_3 = arith.constant 0 : index
    %2 = vector.load %arg2[%c0_2, %c0_3] : memref<250x128xbf16, #tpu.memory_space<vmem>>, vector<250x128xbf16>
    %cst = arith.constant dense<0.000000e+00> : vector<512x128xf32>
    %3 = tpu.matmul %1, %2, %cst {dimension_numbers = #tpu.dot_dimension_numbers<[1], [0], [0], [1], [0, 0, 1, 1], [], []>} : vector<512x250xbf16>, vector<250x128xbf16>, vector<512x128xf32> -> vector<512x128xf32>
    %4 = vector.shape_cast %3 : vector<512x128xf32> to vector<4x128x128xf32>
    %cst_4 = arith.constant dense<0xFF800000> : vector<128x128xf32>
    %5 = vector.multi_reduction <maximumf>, %4, %cst_4 [0] : vector<4x128x128xf32> to vector<128x128xf32>
    %c0_5 = arith.constant 0 : index
    %c0_6 = arith.constant 0 : index
    %6 = vector.load %arg3[%c0_5, %c0_6] : memref<1x128xf32, #tpu.memory_space<vmem>>, vector<1x128xf32>
    %7 = vector.broadcast %6 : vector<1x128xf32> to vector<128x128xf32>
    %8 = arith.addf %5, %7 : vector<128x128xf32>
    %cst_7 = arith.constant 0.000000e+00 : f32
    %9 = vector.broadcast %cst_7 : f32 to vector<128x128xf32>
    %10 = arith.maximumf %8, %9 : vector<128x128xf32>
    %11 = arith.truncf %10 : vector<128x128xf32> to vector<128x128xbf16>
    %c0_8 = arith.constant 0 : index
    %c0_9 = arith.constant 0 : index
    %12 = vector.load %arg4[%c0_8, %c0_9] : memref<128x128xbf16, #tpu.memory_space<vmem>>, vector<128x128xbf16>
    tpu.vector_store %arg4[%c0_8, %c0_9], %11 {strides = array<i32>} : memref<128x128xbf16, #tpu.memory_space<vmem>>, vector<128x128xbf16>,
    return
  }
  func.func @transform_0(%arg0: i32) -> (i32, i32, i32) {
    %c0_i32 = arith.constant 0 : i32
    %c0_i32_0 = arith.constant 0 : i32
    %c0_i32_1 = arith.constant 0 : i32
    return %c0_i32, %arg0, %c0_i32_0 : i32, i32, i32
  }
  func.func @transform_1(%arg0: i32) -> (i32, i32) {
    %c0_i32 = arith.constant 0 : i32
    %c0_i32_0 = arith.constant 0 : i32
    %c0_i32_1 = arith.constant 0 : i32
    return %c0_i32, %c0_i32_0 : i32, i32
  }
  func.func @transform_2(%arg0: i32) -> (i32, i32) {
    %c0_i32 = arith.constant 0 : i32
    %c0_i32_0 = arith.constant 0 : i32
    %c0_i32_1 = arith.constant 0 : i32
    return %c0_i32, %c0_i32_0 : i32, i32
  }
  func.func @transform_3(%arg0: i32) -> (i32, i32) {
    %c0_i32 = arith.constant 0 : i32
    %c0_i32_0 = arith.constant 0 : i32
    return %arg0, %c0_i32 : i32, i32
  }
}

module attributes {stable_mosaic.version = 11 : i64} {
  func.func @_linear_kernel(%arg0: i32, %arg1: memref<128x320xbf16, #tpu.memory_space<vmem>>, %arg2: memref<320x128xbf16, #tpu.memory_space<vmem>>, %arg3: memref<1x128xf32, #tpu.memory_space<vmem>>, %arg4: memref<128x128xf32, #tpu.memory_space<vmem>>) attributes {dimension_semantics = [#tpu.dimension_semantics<parallel>], iteration_bounds = array<i64: 1>, scalar_prefetch = 0 : i64, scratch_operands = 0 : i64, tpu.core_type = #tpu.core_type<tc>, window_params = [{transform_indices = @transform_0, window_bounds = array<i64: 128, 320>}, {pipeline_mode = #tpu.pipeline_mode<synchronous>, transform_indices = @transform_1, window_bounds = array<i64: 320, 128>}, {pipeline_mode = #tpu.pipeline_mode<synchronous>, transform_indices = @transform_2, window_bounds = array<i64: 1, 128>}, {transform_indices = @transform_3, window_bounds = array<i64: 128, 128>}]} {
    %c0 = arith.constant 0 : index
    %c0_0 = arith.constant 0 : index
    %0 = vector.load %arg1[%c0, %c0_0] : memref<128x320xbf16, #tpu.memory_space<vmem>>, vector<128x320xbf16>
    %c0_1 = arith.constant 0 : index
    %c0_2 = arith.constant 0 : index
    %1 = vector.load %arg2[%c0_1, %c0_2] : memref<320x128xbf16, #tpu.memory_space<vmem>>, vector<320x128xbf16>
    %cst = arith.constant dense<0.000000e+00> : vector<128x128xf32>
    %2 = tpu.matmul %0, %1, %cst {dimension_numbers = #tpu.dot_dimension_numbers<[1], [0], [0], [1], [0, 0, 1, 1], [], []>} : vector<128x320xbf16>, vector<320x128xbf16>, vector<128x128xf32> -> vector<128x128xf32>
    %c0_3 = arith.constant 0 : index
    %c0_4 = arith.constant 0 : index
    %3 = vector.load %arg3[%c0_3, %c0_4] : memref<1x128xf32, #tpu.memory_space<vmem>>, vector<1x128xf32>
    %4 = vector.broadcast %3 : vector<1x128xf32> to vector<128x128xf32>
    %5 = arith.addf %2, %4 : vector<128x128xf32>
    %c0_5 = arith.constant 0 : index
    %c0_6 = arith.constant 0 : index
    %6 = vector.load %arg4[%c0_5, %c0_6] : memref<128x128xf32, #tpu.memory_space<vmem>>, vector<128x128xf32>
    tpu.vector_store %arg4[%c0_5, %c0_6], %5 {strides = array<i32>} : memref<128x128xf32, #tpu.memory_space<vmem>>, vector<128x128xf32>,
    return
  }
  func.func @transform_0(%arg0: i32) -> (i32, i32) {
    %c0_i32 = arith.constant 0 : i32
    %c0_i32_0 = arith.constant 0 : i32
    return %arg0, %c0_i32 : i32, i32
  }
  func.func @transform_1(%arg0: i32) -> (i32, i32) {
    %c0_i32 = arith.constant 0 : i32
    %c0_i32_0 = arith.constant 0 : i32
    %c0_i32_1 = arith.constant 0 : i32
    return %c0_i32, %c0_i32_0 : i32, i32
  }
  func.func @transform_2(%arg0: i32) -> (i32, i32) {
    %c0_i32 = arith.constant 0 : i32
    %c0_i32_0 = arith.constant 0 : i32
    %c0_i32_1 = arith.constant 0 : i32
    return %c0_i32, %c0_i32_0 : i32, i32
  }
  func.func @transform_3(%arg0: i32) -> (i32, i32) {
    %c0_i32 = arith.constant 0 : i32
    %c0_i32_0 = arith.constant 0 : i32
    return %arg0, %c0_i32 : i32, i32
  }
}

</mosaic_0001>

<bundles_post_ra>
// kernel: cnn_forward.3
= control target key start
LH: loop header
LB: loop body
LE: loop exit
PB: predicated region body
PF: predicated region fallthrough
CT: control target
= control target key end

     0   :  { %s1500_s12 = smov 0   ;;  %s1502_s13 = smov 0   ;;  %s1726_s0 = inlined_call_operand.vmem [shape: bf16[4,384,25], index: 0, kind: input, shape index: {}]   ;;  %s1727_s1 = inlined_call_operand.vmem [shape: bf16[25,128], index: 1, kind: input, shape index: {}]   ;;  %s1728_s2 = inlined_call_operand.vmem [shape: f32[1,128], index: 2, kind: input, shape index: {}]   ;;  %s1729_s3 = inlined_call_operand.vmem [shape: bf16[384,128], index: 3, kind: output, shape index: {}]  }
   0x1   :  { %s1504_s14 = smov 0  }
   0x2 LB: > { %s1160_s15 = sadd.s32 4294967295, %s1477_s14   ;;  %s1517_s16 = sadd.s32 1, %s1477_s14   ;;  %s1477_s14 = sphi %s1504_s14, %s1732_s14   ;;  %s1473_s13 = sphi %s1502_s13, %s1731_s13   ;;  %s1469_s12 = sphi %s1500_s12, %s1730_s12  }
   0x3   : > { %s17_s17 = ssub.s32 %s1477_s14, %s1517_s16  ;;  %s20_s18 = sadd.s32 1, %s1473_s13 }
   0x4   : > { %p18_p0 = scmp.eq.s32.totalorder %s17_s17, 0  ;;  %p27_p1 = scmp.ne.s32.totalorder %s1473_s13, %s1469_s12 }
   0x5   : > { %p28_p2 = scmp.eq.s32.totalorder %s1477_s14, 0  ;;  %p1163_p4 = scmp.ge.s32.totalorder %s1477_s14, 3 }
   0x6   : > { %s1526_s19 = scalar_select %p18_p0, %s1473_s13, %s20_s18  }
   0x7   : > { %p29_p3 = por %p28_p2, %p27_p1  ;;  %127 = sbr.rel (%p1163_p4) target bundleno = 48 (0x30), region = 24 }
   0xc   : > { %130 = sbr.rel (!%p29_p3) target bundleno = 48 (0x30), region = 28  ;;  %s132_s20 = sand.u32 (%p29_p3), 1, %s1473_s13  }
   0xd   : > { %s1341_s21 = sshll.u32 (%p29_p3), %s1477_s14, 6  ;;  %s1164_s22 = sshll.u32 (%p29_p3), %s132_s20, 8 }
   0xe   : > { %s1534_s25 = scalar_lea.vmem (%p29_p3), %s1726_s0, %s1341_s21  ;;  %s1539_s26 = scalar_lea.vmem (%p29_p3), [#allocation2], %s1164_s22 }
   0xf   : > { %v154_v0 = vld [vmem:[%s1534_s25] sm:$0xff] (%p29_p3)   ;;  %v158_v1 = vld [vmem:[%s1534_s25 + $0x8] sm:$0xff] (%p29_p3)   ;;  %v162_v2 = vld [vmem:[%s1534_s25 + $0x10] sm:$0xff] (%p29_p3)  }
  0x10   : > { %155 = vst [vmem:[%s1539_s26] sm:$0xff] (%p29_p3), %v154_v0   ;;  %v166_v3 = vld [vmem:[%s1534_s25 + $0x18] sm:$0xff] (%p29_p3)   ;;  %v170_v4 = vld [vmem:[%s1534_s25 + $0x20] sm:$0xff] (%p29_p3)   ;;  %v174_v5 = vld [vmem:[%s1534_s25 + $0x28] sm:$0xff] (%p29_p3)  }
  0x11   : > { %159 = vst [vmem:[%s1539_s26 + $0x8] sm:$0xff] %v158_v1   ;;  %v178_v6 = vld [vmem:[%s1534_s25 + $0x30] sm:$0xff]   ;;  %v182_v7 = vld [vmem:[%s1534_s25 + $0x38] sm:$0xff]   ;;  %v186_v8 = vld [vmem:[%s1534_s25 + $0xc0] sm:$0xff]  }
  0x12   : > { %163 = vst [vmem:[%s1539_s26 + $0x10] sm:$0xff] %v162_v2   ;;  %v190_v9 = vld [vmem:[%s1534_s25 + $0xc8] sm:$0xff]   ;;  %v194_v10 = vld [vmem:[%s1534_s25 + $0xd0] sm:$0xff]   ;;  %v198_v11 = vld [vmem:[%s1534_s25 + $0xd8] sm:$0xff]  }
  0x13   : > { %167 = vst [vmem:[%s1539_s26 + $0x18] sm:$0xff] %v166_v3   ;;  %v202_v12 = vld [vmem:[%s1534_s25 + $0xe0] sm:$0xff]   ;;  %v206_v13 = vld [vmem:[%s1534_s25 + $0xe8] sm:$0xff]   ;;  %v210_v14 = vld [vmem:[%s1534_s25 + $0xf0] sm:$0xff]  }
  0x14   : > { %171 = vst [vmem:[%s1539_s26 + $0x20] sm:$0xff] %v170_v4   ;;  %v214_v15 = vld [vmem:[%s1534_s25 + $0xf8] sm:$0xff]   ;;  %v218_v16 = vld [vmem:[%s1534_s25 + $0x180] sm:$0xff]   ;;  %v222_v17 = vld [vmem:[%s1534_s25 + $0x188] sm:$0xff]  }
  0x15   : > { %175 = vst [vmem:[%s1539_s26 + $0x28] sm:$0xff] %v174_v5   ;;  %v226_v18 = vld [vmem:[%s1534_s25 + $0x190] sm:$0xff]   ;;  %v230_v19 = vld [vmem:[%s1534_s25 + $0x198] sm:$0xff]   ;;  %v234_v20 = vld [vmem:[%s1534_s25 + $0x1a0] sm:$0xff]  }
  0x16   : > { %179 = vst [vmem:[%s1539_s26 + $0x30] sm:$0xff] %v178_v6   ;;  %v238_v21 = vld [vmem:[%s1534_s25 + $0x1a8] sm:$0xff]   ;;  %v242_v22 = vld [vmem:[%s1534_s25 + $0x1b0] sm:$0xff]   ;;  %v246_v23 = vld [vmem:[%s1534_s25 + $0x1b8] sm:$0xff]  }
  0x17   : > { %183 = vst [vmem:[%s1539_s26 + $0x38] sm:$0xff] %v182_v7   ;;  %v250_v24 = vld [vmem:[%s1534_s25 + $0x240] sm:$0xff]   ;;  %v254_v25 = vld [vmem:[%s1534_s25 + $0x248] sm:$0xff]   ;;  %v258_v26 = vld [vmem:[%s1534_s25 + $0x250] sm:$0xff]  }
  0x18   : > { %187 = vst [vmem:[%s1539_s26 + $0x40] sm:$0xff] %v186_v8   ;;  %v262_v27 = vld [vmem:[%s1534_s25 + $0x258] sm:$0xff]   ;;  %v266_v28 = vld [vmem:[%s1534_s25 + $0x260] sm:$0xff]   ;;  %v270_v29 = vld [vmem:[%s1534_s25 + $0x268] sm:$0xff]  }
  0x19   : > { %191 = vst [vmem:[%s1539_s26 + $0x48] sm:$0xff] %v190_v9   ;;  %v274_v30 = vld [vmem:[%s1534_s25 + $0x270] sm:$0xff]   ;;  %v278_v31 = vld [vmem:[%s1534_s25 + $0x278] sm:$0xff]  }
  0x1a   : > { %195 = vst [vmem:[%s1539_s26 + $0x50] sm:$0xff] %v194_v10  }
  0x1b   : > { %199 = vst [vmem:[%s1539_s26 + $0x58] sm:$0xff] %v198_v11  }
  0x1c   : > { %203 = vst [vmem:[%s1539_s26 + $0x60] sm:$0xff] %v202_v12  }
  0x1d   : > { %207 = vst [vmem:[%s1539_s26 + $0x68] sm:$0xff] %v206_v13  }
  0x1e   : > { %211 = vst [vmem:[%s1539_s26 + $0x70] sm:$0xff] %v210_v14  }
  0x1f   : > { %215 = vst [vmem:[%s1539_s26 + $0x78] sm:$0xff] %v214_v15  }
  0x20   : > { %219 = vst [vmem:[%s1539_s26 + $0x80] sm:$0xff] %v218_v16  }
  0x21   : > { %223 = vst [vmem:[%s1539_s26 + $0x88] sm:$0xff] %v222_v17  }
  0x22   : > { %227 = vst [vmem:[%s1539_s26 + $0x90] sm:$0xff] %v226_v18  }
  0x23   : > { %231 = vst [vmem:[%s1539_s26 + $0x98] sm:$0xff] %v230_v19  }
  0x24   : > { %235 = vst [vmem:[%s1539_s26 + $0xa0] sm:$0xff] %v234_v20  }
  0x25   : > { %239 = vst [vmem:[%s1539_s26 + $0xa8] sm:$0xff] %v238_v21  }
  0x26   : > { %243 = vst [vmem:[%s1539_s26 + $0xb0] sm:$0xff] %v242_v22  }
  0x27   : > { %247 = vst [vmem:[%s1539_s26 + $0xb8] sm:$0xff] %v246_v23  }
  0x28   : > { %251 = vst [vmem:[%s1539_s26 + $0xc0] sm:$0xff] %v250_v24  }
  0x29   : > { %255 = vst [vmem:[%s1539_s26 + $0xc8] sm:$0xff] %v254_v25  }
  0x2a   : > { %259 = vst [vmem:[%s1539_s26 + $0xd0] sm:$0xff] %v258_v26  }
  0x2b   : > { %263 = vst [vmem:[%s1539_s26 + $0xd8] sm:$0xff] %v262_v27  }
  0x2c   : > { %267 = vst [vmem:[%s1539_s26 + $0xe0] sm:$0xff] %v266_v28  }
  0x2d   : > { %271 = vst [vmem:[%s1539_s26 + $0xe8] sm:$0xff] %v270_v29  }
  0x2e   : > { %275 = vst [vmem:[%s1539_s26 + $0xf0] sm:$0xff] %v274_v30  }
  0x2f   : > { %279 = vst [vmem:[%s1539_s26 + $0xf8] sm:$0xff] %v278_v31  }
  0x30 PF: > { %p1167_p5 = scmp.ge.s32.totalorder %s1477_s14, 1  ;;  %p432_p6 = scmp.lt.s32.totalorder %s1477_s14, 4 }
  0x32   : > { %p433_p7 = pnand %p1167_p5, %p432_p6 }
  0x33   : > { %s439_s4 = sand.u32 (!%p433_p7), 1, %s1469_s12   ;;  %s1169_s9 = sshll.u32 (!%p433_p7), %s1160_s15, 4 }
  0x34   : > { %436 = sbr.rel (%p433_p7) target bundleno = 334 (0x14e), region = 69  ;;  %s1168_s5 = sshll.u32 (!%p433_p7), %s439_s4, 8 }
  0x35   : > { %s1614_s8 = scalar_lea.vmem (!%p433_p7), [#allocation2], %s1168_s5  ;;  %p464_p8 = scmp.lt.s32.totalorder (!%p433_p7), %s1169_s9, 47 }
  0x39   : > { %v1305_v32 = vld [vmem:[%s1727_s1 + $0x8] sm:$0xf]  ;;  %v1375_v33 = vld [vmem:[%s1727_s1 + $0x8] sm:$0x10]  ;;  %vm806_vm0 = vcmask 1043456   ;;  %vm807_vm1 = vcmask 1044480  }
  0x3a   : > { %v1306_v34 = vor.u32 %v1375_v33, %v1305_v32  ;;  %v1479_v35 = vmov 65535   ;;  %v1374_v39 = vld [vmem:[%s1727_s1] sm:$0xff]  ;;  %vm709_vm2 = vcmask 203776   ;;  %v1343_v44 = vld [vmem:[%s1614_s8 + $0x8] sm:$0xff]  ;;  %v1344_v48 = vld [vmem:[%s1614_s8 + $0x10] sm:$0xff]  ;;  %s1734_s9 = smov (!%p464_p8, %s1169_s9), 47 }
  0x3b   : > { %v808_v36 = vsel %vm806_vm0, 4294967295, %v1479_v35  ;;  %v1342_v40 = vld [vmem:[%s1614_s8] sm:$0xff]  ;;  %v1351_v45 = vld [vmem:[%s1614_s8 + $0x48] sm:$0xff]  ;;  %v1352_v49 = vld [vmem:[%s1614_s8 + $0x50] sm:$0xff]  ;;  %s1170_s12 = sshll.u32 %s1734_s9, 2 }
  0x3c   : > { %v809_v37 = vsel %vm807_vm1, %v808_v36, 0  ;;  %v1350_v41 = vld [vmem:[%s1614_s8 + $0x40] sm:$0xff]  ;;  %v1359_v46 = vld [vmem:[%s1614_s8 + $0x88] sm:$0xff]  ;;  %v1360_v50 = vld [vmem:[%s1614_s8 + $0x90] sm:$0xff]  ;;  %s1692_s17 = scalar_lea.vmem %s1729_s3, %s1170_s12 }
  0x3d   : > { %v811_v38 = vand.u32 %v1306_v34, %v809_v37  ;;  %v1358_v42 = vld [vmem:[%s1614_s8 + $0x80] sm:$0xff]  ;;  %v1367_v47 = vld [vmem:[%s1614_s8 + $0xc8] sm:$0xff]  ;;  %v1368_v51 = vld [vmem:[%s1614_s8 + $0xd0] sm:$0xff] }
  0x3e   : > { %v1366_v43 = vld [vmem:[%s1614_s8 + $0xc0] sm:$0xff]  ;;  %v1345_v52 = vld [vmem:[%s1614_s8 + $0x18] sm:$0xff]  ;;  %v1347_v60 = vld [vmem:[%s1614_s8 + $0x28] sm:$0xff] }
  0x3f   : > { %819 = vmatpush.bf16.msra.mxu0 %v811_v38  ;;  %1423 = vmatpush.bf16.msra.mxu1 %v811_v38  ;;  %v1353_v53 = vld [vmem:[%s1614_s8 + $0x58] sm:$0xff]  ;;  %v1346_v56 = vld [vmem:[%s1614_s8 + $0x20] sm:$0xff]  ;;  %v1355_v61 = vld [vmem:[%s1614_s8 + $0x68] sm:$0xff] }
  0x40   : > { %1424 = vmatpush.bf16.msra.mxu2 %v811_v38  ;;  %1425 = vmatpush.bf16.msra.mxu3 %v811_v38  ;;  %v1361_v54 = vld [vmem:[%s1614_s8 + $0x98] sm:$0xff]  ;;  %v1354_v57 = vld [vmem:[%s1614_s8 + $0x60] sm:$0xff]  ;;  %v1363_v62 = vld [vmem:[%s1614_s8 + $0xa8] sm:$0xff] }
  0x41   : > { %v1369_v55 = vld [vmem:[%s1614_s8 + $0xd8] sm:$0xff]  ;;  %v1362_v58 = vld [vmem:[%s1614_s8 + $0xa0] sm:$0xff]  ;;  %v1371_v63 = vld [vmem:[%s1614_s8 + $0xe8] sm:$0xff] }
  0x42   : > { %v1370_v59 = vld [vmem:[%s1614_s8 + $0xe0] sm:$0xff]  ;;  %v1348_v0 = vld [vmem:[%s1614_s8 + $0x30] sm:$0xff]  ;;  %v1349_v4 = vld [vmem:[%s1614_s8 + $0x38] sm:$0xff] }
  0x43   : > { %820 = vmatpush.bf16.msra.mxu0 %v1374_v39  ;;  %1426 = vmatpush.bf16.msra.mxu1 %v1374_v39  ;;  %v1356_v1 = vld [vmem:[%s1614_s8 + $0x70] sm:$0xff]  ;;  %v1357_v5 = vld [vmem:[%s1614_s8 + $0x78] sm:$0xff]  ;;  %v1685_v17 = vld [vmem:[%s1728_s2] ss:$0 sm:$0xff] }
  0x44   : > { %1427 = vmatpush.bf16.msra.mxu2 %v1374_v39  ;;  %1428 = vmatpush.bf16.msra.mxu3 %v1374_v39  ;;  %v1364_v2 = vld [vmem:[%s1614_s8 + $0xb0] sm:$0xff]  ;;  %v1365_v6 = vld [vmem:[%s1614_s8 + $0xb8] sm:$0xff] }
  0x45   : > { %v1372_v3 = vld [vmem:[%s1614_s8 + $0xf0] sm:$0xff]  ;;  %v1373_v7 = vld [vmem:[%s1614_s8 + $0xf8] sm:$0xff] }
  0x46   : > { %1307 = vmatmul.msk.bf16.vlgmr.msra.gmra.mxu0 %vm709_vm2, %v1342_v40  ;;  %1315 = vmatmul.msk.bf16.vlgmr.msra.gmra.mxu1 %vm709_vm2, %v1350_v41 }
  0x47   : > { %1323 = vmatmul.msk.bf16.vlgmr.msra.gmra.mxu2 %vm709_vm2, %v1358_v42  ;;  %1331 = vmatmul.msk.bf16.vlgmr.msra.gmra.mxu3 %vm709_vm2, %v1366_v43 }
  0x56   : > { %1308 = vmatmul.msk.bf16.gmra.mxu0 %vm709_vm2, %v1343_v44  ;;  %1316 = vmatmul.msk.bf16.gmra.mxu1 %vm709_vm2, %v1351_v45 }
  0x57   : > { %1324 = vmatmul.msk.bf16.gmra.mxu2 %vm709_vm2, %v1359_v46  ;;  %1332 = vmatmul.msk.bf16.gmra.mxu3 %vm709_vm2, %v1367_v47 }
  0x66   : > { %1309 = vmatmul.msk.bf16.gmra.mxu0 %vm709_vm2, %v1344_v48  ;;  %1317 = vmatmul.msk.bf16.gmra.mxu1 %vm709_vm2, %v1352_v49 }
  0x67   : > { %1325 = vmatmul.msk.bf16.gmra.mxu2 %vm709_vm2, %v1360_v50  ;;  %1333 = vmatmul.msk.bf16.gmra.mxu3 %vm709_vm2, %v1368_v51 }
  0x76   : > { %1310 = vmatmul.msk.bf16.gmra.mxu0 %vm709_vm2, %v1345_v52  ;;  %1318 = vmatmul.msk.bf16.gmra.mxu1 %vm709_vm2, %v1353_v53 }
  0x77   : > { %1326 = vmatmul.msk.bf16.gmra.mxu2 %vm709_vm2, %v1361_v54  ;;  %1334 = vmatmul.msk.bf16.gmra.mxu3 %vm709_vm2, %v1369_v55 }
  0x86   : > { %1311 = vmatmul.msk.bf16.gmra.mxu0 %vm709_vm2, %v1346_v56  ;;  %1319 = vmatmul.msk.bf16.gmra.mxu1 %vm709_vm2, %v1354_v57 }
  0x87   : > { %1327 = vmatmul.msk.bf16.gmra.mxu2 %vm709_vm2, %v1362_v58  ;;  %1335 = vmatmul.msk.bf16.gmra.mxu3 %vm709_vm2, %v1370_v59 }
  0x96   : > { %1312 = vmatmul.msk.bf16.gmra.mxu0 %vm709_vm2, %v1347_v60  ;;  %1320 = vmatmul.msk.bf16.gmra.mxu1 %vm709_vm2, %v1355_v61 }
  0x97   : > { %1328 = vmatmul.msk.bf16.gmra.mxu2 %vm709_vm2, %v1363_v62  ;;  %1336 = vmatmul.msk.bf16.gmra.mxu3 %vm709_vm2, %v1371_v63 }
  0xa6   : > { %1313 = vmatmul.msk.bf16.gmra.mxu0 %vm709_vm2, %v1348_v0  ;;  %1321 = vmatmul.msk.bf16.gmra.mxu1 %vm709_vm2, %v1356_v1 }
  0xa7   : > { %1329 = vmatmul.msk.bf16.gmra.mxu2 %vm709_vm2, %v1364_v2  ;;  %1337 = vmatmul.msk.bf16.gmra.mxu3 %vm709_vm2, %v1372_v3 }
  0xb6   : > { %1314 = vmatmul.msk.bf16.gmra.mxu0 %vm709_vm2, %v1349_v4  ;;  %1322 = vmatmul.msk.bf16.gmra.mxu1 %vm709_vm2, %v1357_v5 }
  0xb7   : > { %1330 = vmatmul.msk.bf16.gmra.mxu2 %vm709_vm2, %v1365_v6  ;;  %1338 = vmatmul.msk.bf16.gmra.mxu3 %vm709_vm2, %v1373_v7 }
  0xc3   : > { %v822_v8 = vpop.f32.mrf.mxu0  ;;  %v862_v9 = vpop.f32.mrf.mxu1 }
  0xc4   : > { %v982_v10 = vmax.f32 %v822_v8, %v862_v9 }
  0xca   : > { %v902_v11 = vpop.f32.mrf.mxu2  ;;  %v942_v12 = vpop.f32.mrf.mxu3 }
  0xcb   : > { %v824_v13 = vpop.f32.mrf.mxu0  ;;  %v864_v14 = vpop.f32.mrf.mxu1  ;;  %v983_v15 = vmax.f32 %v982_v10, %v902_v11 }
  0xcc   : > { %v985_v18 = vmax.f32 %v824_v13, %v864_v14 }
  0xcd   : > { %v984_v16 = vmax.f32 %v983_v15, %v942_v12 }
  0xcf   : > { %v1034_v24 = vadd.f32 %v1685_v17, %v984_v16 }
  0xd1   : > { %v1050_v27 = vmax.f32 %v1034_v24, 0.0 }
  0xd2   : > { %v904_v19 = vpop.f32.mrf.mxu2  ;;  %v944_v20 = vpop.f32.mrf.mxu3 }
  0xd3   : > { %v986_v21 = vmax.f32 %v985_v18, %v904_v19  ;;  %v827_v22 = vpop.f32.mrf.mxu0  ;;  %v867_v23 = vpop.f32.mrf.mxu1 }
  0xd4   : > { %v988_v29 = vmax.f32 %v827_v22, %v867_v23 }
  0xd5   : > { %v987_v25 = vmax.f32 %v986_v21, %v944_v20 }
  0xd7   : > { %v1035_v26 = vadd.f32 %v1685_v17, %v987_v25 }
  0xd9   : > { %v1051_v28 = vmax.f32 %v1035_v26, 0.0 }
  0xda   : > { %v907_v30 = vpop.f32.mrf.mxu2  ;;  %v947_v31 = vpop.f32.mrf.mxu3 }
  0xdb   : > { %v1379_v32 = vpack.c.bf16 %v1051_v28, %v1050_v27  ;;  %v829_v33 = vpop.f32.mrf.mxu0  ;;  %v869_v34 = vpop.f32.mrf.mxu1  ;;  %v989_v35 = vmax.f32 %v988_v29, %v907_v30 }
  0xdc   : > { %v991_v37 = vmax.f32 %v829_v33, %v869_v34 }
  0xdd   : > { %1380 = vst [vmem:[%s1692_s17] sm:$0xff] %v1379_v32   ;;  %v990_v36 = vmax.f32 %v989_v35, %v947_v31 }
  0xdf   : > { %v1036_v43 = vadd.f32 %v1685_v17, %v990_v36 }
  0xe1   : > { %v1052_v46 = vmax.f32 %v1036_v43, 0.0 }
  0xe2   : > { %v909_v38 = vpop.f32.mrf.mxu2  ;;  %v949_v39 = vpop.f32.mrf.mxu3 }
  0xe3   : > { %v992_v40 = vmax.f32 %v991_v37, %v909_v38  ;;  %v832_v41 = vpop.f32.mrf.mxu0  ;;  %v872_v42 = vpop.f32.mrf.mxu1 }
  0xe4   : > { %v994_v48 = vmax.f32 %v832_v41, %v872_v42 }
  0xe5   : > { %v993_v44 = vmax.f32 %v992_v40, %v949_v39 }
  0xe7   : > { %v1037_v45 = vadd.f32 %v1685_v17, %v993_v44 }
  0xe9   : > { %v1053_v47 = vmax.f32 %v1037_v45, 0.0 }
  0xea   : > { %v912_v49 = vpop.f32.mrf.mxu2  ;;  %v952_v50 = vpop.f32.mrf.mxu3 }
  0xeb   : > { %v1384_v51 = vpack.c.bf16 %v1053_v47, %v1052_v46  ;;  %v834_v52 = vpop.f32.mrf.mxu0  ;;  %v874_v53 = vpop.f32.mrf.mxu1  ;;  %v995_v54 = vmax.f32 %v994_v48, %v912_v49 }
  0xec   : > { %v997_v56 = vmax.f32 %v834_v52, %v874_v53 }
  0xed   : > { %1416 = vst [vmem:[%s1692_s17 + $0x8] sm:$0xff] %v1384_v51   ;;  %v996_v55 = vmax.f32 %v995_v54, %v952_v50 }
  0xef   : > { %v1038_v62 = vadd.f32 %v1685_v17, %v996_v55 }
  0xf1   : > { %v1054_v1 = vmax.f32 %v1038_v62, 0.0 }
  0xf2   : > { %v914_v57 = vpop.f32.mrf.mxu2  ;;  %v954_v58 = vpop.f32.mrf.mxu3 }
  0xf3   : > { %v998_v59 = vmax.f32 %v997_v56, %v914_v57  ;;  %v837_v60 = vpop.f32.mrf.mxu0  ;;  %v877_v61 = vpop.f32.mrf.mxu1 }
  0xf4   : > { %v1000_v3 = vmax.f32 %v837_v60, %v877_v61 }
  0xf5   : > { %v999_v63 = vmax.f32 %v998_v59, %v954_v58 }
  0xf7   : > { %v1039_v0 = vadd.f32 %v1685_v17, %v999_v63 }
  0xf9   : > { %v1055_v2 = vmax.f32 %v1039_v0, 0.0 }
  0xfa   : > { %v917_v4 = vpop.f32.mrf.mxu2  ;;  %v957_v5 = vpop.f32.mrf.mxu3 }
  0xfb   : > { %v1389_v6 = vpack.c.bf16 %v1055_v2, %v1054_v1  ;;  %v839_v7 = vpop.f32.mrf.mxu0  ;;  %v879_v8 = vpop.f32.mrf.mxu1  ;;  %v1001_v9 = vmax.f32 %v1000_v3, %v917_v4 }
  0xfc   : > { %v1003_v11 = vmax.f32 %v839_v7, %v879_v8 }
  0xfd   : > { %1417 = vst [vmem:[%s1692_s17 + $0x10] sm:$0xff] %v1389_v6   ;;  %v1002_v10 = vmax.f32 %v1001_v9, %v957_v5 }
  0xff   : > { %v1040_v18 = vadd.f32 %v1685_v17, %v1002_v10 }
 0x101   : > { %v1056_v21 = vmax.f32 %v1040_v18, 0.0 }
 0x102   : > { %v919_v12 = vpop.f32.mrf.mxu2  ;;  %v959_v13 = vpop.f32.mrf.mxu3 }
 0x103   : > { %v1004_v14 = vmax.f32 %v1003_v11, %v919_v12  ;;  %v842_v15 = vpop.f32.mrf.mxu0  ;;  %v882_v16 = vpop.f32.mrf.mxu1 }
 0x104   : > { %v1006_v23 = vmax.f32 %v842_v15, %v882_v16 }
 0x105   : > { %v1005_v19 = vmax.f32 %v1004_v14, %v959_v13 }
 0x107   : > { %v1041_v20 = vadd.f32 %v1685_v17, %v1005_v19 }
 0x109   : > { %v1057_v22 = vmax.f32 %v1041_v20, 0.0 }
 0x10a   : > { %v922_v24 = vpop.f32.mrf.mxu2  ;;  %v962_v25 = vpop.f32.mrf.mxu3 }
 0x10b   : > { %v1394_v26 = vpack.c.bf16 %v1057_v22, %v1056_v21  ;;  %v844_v27 = vpop.f32.mrf.mxu0  ;;  %v884_v28 = vpop.f32.mrf.mxu1  ;;  %v1007_v29 = vmax.f32 %v1006_v23, %v922_v24 }
 0x10c   : > { %v1009_v31 = vmax.f32 %v844_v27, %v884_v28 }
 0x10d   : > { %1418 = vst [vmem:[%s1692_s17 + $0x18] sm:$0xff] %v1394_v26   ;;  %v1008_v30 = vmax.f32 %v1007_v29, %v962_v25 }
 0x10f   : > { %v1042_v37 = vadd.f32 %v1685_v17, %v1008_v30 }
 0x111   : > { %v1058_v40 = vmax.f32 %v1042_v37, 0.0 }
 0x112   : > { %v924_v32 = vpop.f32.mrf.mxu2  ;;  %v964_v33 = vpop.f32.mrf.mxu3 }
 0x113   : > { %v1010_v34 = vmax.f32 %v1009_v31, %v924_v32  ;;  %v847_v35 = vpop.f32.mrf.mxu0  ;;  %v887_v36 = vpop.f32.mrf.mxu1 }
 0x114   : > { %v1012_v42 = vmax.f32 %v847_v35, %v887_v36 }
 0x115   : > { %v1011_v38 = vmax.f32 %v1010_v34, %v964_v33 }
 0x117   : > { %v1043_v39 = vadd.f32 %v1685_v17, %v1011_v38 }
 0x119   : > { %v1059_v41 = vmax.f32 %v1043_v39, 0.0 }
 0x11a   : > { %v927_v43 = vpop.f32.mrf.mxu2  ;;  %v967_v44 = vpop.f32.mrf.mxu3 }
 0x11b   : > { %v1399_v45 = vpack.c.bf16 %v1059_v41, %v1058_v40  ;;  %v849_v46 = vpop.f32.mrf.mxu0  ;;  %v889_v47 = vpop.f32.mrf.mxu1  ;;  %v1013_v48 = vmax.f32 %v1012_v42, %v927_v43 }
 0x11c   : > { %v1015_v50 = vmax.f32 %v849_v46, %v889_v47 }
 0x11d   : > { %1419 = vst [vmem:[%s1692_s17 + $0x20] sm:$0xff] %v1399_v45   ;;  %v1014_v49 = vmax.f32 %v1013_v48, %v967_v44 }
 0x11f   : > { %v1044_v56 = vadd.f32 %v1685_v17, %v1014_v49 }
 0x121   : > { %v1060_v59 = vmax.f32 %v1044_v56, 0.0 }
 0x122   : > { %v929_v51 = vpop.f32.mrf.mxu2  ;;  %v969_v52 = vpop.f32.mrf.mxu3 }
 0x123   : > { %v1016_v53 = vmax.f32 %v1015_v50, %v929_v51  ;;  %v852_v54 = vpop.f32.mrf.mxu0  ;;  %v892_v55 = vpop.f32.mrf.mxu1 }
 0x124   : > { %v1018_v61 = vmax.f32 %v852_v54, %v892_v55 }
 0x125   : > { %v1017_v57 = vmax.f32 %v1016_v53, %v969_v52 }
 0x127   : > { %v1045_v58 = vadd.f32 %v1685_v17, %v1017_v57 }
 0x129   : > { %v1061_v60 = vmax.f32 %v1045_v58, 0.0 }
 0x12a   : > { %v932_v62 = vpop.f32.mrf.mxu2  ;;  %v972_v63 = vpop.f32.mrf.mxu3 }
 0x12b   : > { %v1404_v0 = vpack.c.bf16 %v1061_v60, %v1060_v59  ;;  %v854_v1 = vpop.f32.mrf.mxu0  ;;  %v894_v2 = vpop.f32.mrf.mxu1  ;;  %v1019_v3 = vmax.f32 %v1018_v61, %v932_v62 }
 0x12c   : > { %v1021_v5 = vmax.f32 %v854_v1, %v894_v2 }
 0x12d   : > { %1420 = vst [vmem:[%s1692_s17 + $0x28] sm:$0xff] %v1404_v0   ;;  %v1020_v4 = vmax.f32 %v1019_v3, %v972_v63 }
 0x12f   : > { %v1046_v11 = vadd.f32 %v1685_v17, %v1020_v4 }
 0x131   : > { %v1062_v14 = vmax.f32 %v1046_v11, 0.0 }
 0x132   : > { %v934_v6 = vpop.f32.mrf.mxu2  ;;  %v974_v7 = vpop.f32.mrf.mxu3 }
 0x133   : > { %v1022_v8 = vmax.f32 %v1021_v5, %v934_v6  ;;  %v857_v9 = vpop.f32.mrf.mxu0  ;;  %v897_v10 = vpop.f32.mrf.mxu1 }
 0x134   : > { %v1024_v16 = vmax.f32 %v857_v9, %v897_v10 }
 0x135   : > { %v1023_v12 = vmax.f32 %v1022_v8, %v974_v7 }
 0x137   : > { %v1047_v13 = vadd.f32 %v1685_v17, %v1023_v12 }
 0x139   : > { %v1063_v15 = vmax.f32 %v1047_v13, 0.0 }
 0x13a   : > { %v937_v18 = vpop.f32.mrf.mxu2  ;;  %v977_v19 = vpop.f32.mrf.mxu3 }
 0x13b   : > { %v1409_v20 = vpack.c.bf16 %v1063_v15, %v1062_v14  ;;  %v1025_v21 = vmax.f32 %v1024_v16, %v937_v18  ;;  %v859_v22 = vpop.f32.mrf.mxu0  ;;  %v899_v23 = vpop.f32.mrf.mxu1 }
 0x13c   : > { %v1027_v25 = vmax.f32 %v859_v22, %v899_v23 }
 0x13d   : > { %1421 = vst [vmem:[%s1692_s17 + $0x30] sm:$0xff] %v1409_v20   ;;  %v1026_v24 = vmax.f32 %v1025_v21, %v977_v19 }
 0x13f   : > { %v1048_v29 = vadd.f32 %v1685_v17, %v1026_v24 }
 0x141   : > { %v1064_v32 = vmax.f32 %v1048_v29, 0.0 }
 0x142   : > { %v939_v26 = vpop.f32.mrf.mxu2  ;;  %v979_v28 = vpop.f32.mrf.mxu3 }
 0x143   : > { %v1028_v27 = vmax.f32 %v1027_v25, %v939_v26 }
 0x145   : > { %v1029_v30 = vmax.f32 %v1028_v27, %v979_v28 }
 0x147   : > { %v1049_v31 = vadd.f32 %v1685_v17, %v1029_v30 }
 0x149   : > { %v1065_v33 = vmax.f32 %v1049_v31, 0.0 }
 0x14b   : > { %v1414_v34 = vpack.c.bf16 %v1065_v33, %v1064_v32 }
 0x14d   : > { %1422 = vst [vmem:[%s1692_s17 + $0x38] sm:$0xff] %v1414_v34  }
 0x14e PF: > { %p10_p9 = scmp.ge.s32.totalorder %s1517_s16, 5   ;;  %s1730_s12 = smov %s1473_s13 }
 0x14f   : > { %s1731_s13 = smov %s1526_s19  ;;  %s1732_s14 = smov %s1517_s16 }
 0x150   :  { %12 = sbr.rel (!%p10_p9) target bundleno = 2 (0x2), region = 108 }

// kernel: cnn_forward.4
= control target key start
LH: loop header
LB: loop body
LE: loop exit
PB: predicated region body
PF: predicated region fallthrough
CT: control target
= control target key end

     0   :  { %vm590_vm0 = vcmask 1044480   ;;  %vm493_vm1 = vcmask 998400   ;;  %s2176_s1 = inlined_call_operand.vmem [shape: bf16[250,128], index: 1, kind: input, shape index: {}]   ;;  %s2177_s0 = inlined_call_operand.vmem [shape: bf16[4,128,250], index: 0, kind: input, shape index: {}]   ;;  %s2178_s2 = inlined_call_operand.vmem [shape: f32[1,128], index: 2, kind: input, shape index: {}]   ;;  %s2179_s3 = inlined_call_operand.vmem [shape: bf16[128,128], index: 3, kind: output, shape index: {}]  }
   0x1   :  { %v1475_v0 = vld [vmem:[%s2176_s1 + $0x38] sm:$0xff]  ;;  %v1474_v4 = vld [vmem:[%s2176_s1 + $0x30] sm:$0xff]  ;;  %v1473_v7 = vld [vmem:[%s2176_s1 + $0x28] sm:$0xff] }
   0x2   :  { %v1370_v1 = vld [vmem:[%s2176_s1 + $0x78] sm:$0xf]  ;;  %v1483_v2 = vld [vmem:[%s2176_s1 + $0x78] sm:$0x10]  ;;  %594 = vmatpush.bf16.msra.mxu0 %v1475_v0  ;;  %1531 = vmatpush.bf16.msra.mxu2 %v1475_v0  ;;  %v1482_v6 = vld [vmem:[%s2176_s1 + $0x70] sm:$0xff] }
   0x3   :  { %v1371_v3 = vor.u32 %v1483_v2, %v1370_v1  ;;  %v1481_v8 = vld [vmem:[%s2176_s1 + $0x68] sm:$0xff]  ;;  %v1472_v9 = vld [vmem:[%s2176_s1 + $0x20] sm:$0xff]  ;;  %v1471_v11 = vld [vmem:[%s2176_s1 + $0x18] sm:$0xff] }
   0x4   :  { %v1480_v10 = vld [vmem:[%s2176_s1 + $0x60] sm:$0xff]  ;;  %v1479_v12 = vld [vmem:[%s2176_s1 + $0x58] sm:$0xff]  ;;  %v1470_v13 = vld [vmem:[%s2176_s1 + $0x10] sm:$0xff] }
   0x5   :  { %v592_v5 = vsel %vm590_vm0, %v1371_v3, 0  ;;  %v1478_v14 = vld [vmem:[%s2176_s1 + $0x50] sm:$0xff]  ;;  %v1469_v15 = vld [vmem:[%s2176_s1 + $0x8] sm:$0xff]  ;;  %v1468_v17 = vld [vmem:[%s2176_s1] sm:$0xff] }
   0x6   :  { %763 = vmatpush.bf16.msra.mxu1 %v592_v5  ;;  %1539 = vmatpush.bf16.msra.mxu3 %v592_v5  ;;  %v1477_v16 = vld [vmem:[%s2176_s1 + $0x48] sm:$0xff]  ;;  %v1054_v18 = vld [vmem:[%s2177_s0] sm:$0xf]  ;;  %v1404_v23 = vld [vmem:[%s2177_s0 + $0x4] sm:$0xf] }
   0x7   :  { %595 = vmatpush.bf16.msra.mxu0 %v1474_v4  ;;  %1532 = vmatpush.bf16.msra.mxu2 %v1474_v4  ;;  %v1405_v19 = vld [vmem:[%s2177_s0 + $0x4] sm:$0xf0]  ;;  %v1182_v20 = vld [vmem:[%s2177_s0 + $0x100] sm:$0xf]  ;;  %v1056_v24 = vld [vmem:[%s2177_s0 + $0x8] sm:$0xf0] }
   0x8   :  { %v1437_v21 = vld [vmem:[%s2177_s0 + $0x104] sm:$0xf0]  ;;  %v1476_v22 = vld [vmem:[%s2176_s1 + $0x40] sm:$0xff]  ;;  %v1184_v26 = vld [vmem:[%s2177_s0 + $0x108] sm:$0xf0]  ;;  %v1055_v27 = vor.u32 %v1405_v19, %v1054_v18  ;;  %v1059_v29 = vor.u32 %v1404_v23, %v1056_v24 }
   0x9   :  { %v1436_v25 = vld [vmem:[%s2177_s0 + $0x104] sm:$0xf]  ;;  %v1183_v28 = vor.u32 %v1437_v21, %v1182_v20  ;;  %v1062_v31 = vld [vmem:[%s2177_s0 + $0x10] sm:$0xf]  ;;  %v1407_v32 = vld [vmem:[%s2177_s0 + $0x14] sm:$0xf0] }
   0xa   :  { %764 = vmatpush.bf16.msra.mxu1 %v1482_v6  ;;  %1540 = vmatpush.bf16.msra.mxu3 %v1482_v6  ;;  %v1187_v30 = vor.u32 %v1436_v25, %v1184_v26  ;;  %v1190_v33 = vld [vmem:[%s2177_s0 + $0x110] sm:$0xf]  ;;  %v1439_v34 = vld [vmem:[%s2177_s0 + $0x114] sm:$0xf0]  ;;  %v1406_v35 = vld [vmem:[%s2177_s0 + $0x14] sm:$0xf]  ;;  %v1063_v39 = vor.u32 %v1407_v32, %v1062_v31 }
   0xb   :  { %596 = vmatpush.bf16.msra.mxu0 %v1473_v7  ;;  %1533 = vmatpush.bf16.msra.mxu2 %v1473_v7  ;;  %v1064_v36 = vld [vmem:[%s2177_s0 + $0x18] sm:$0xf0]  ;;  %v1438_v37 = vld [vmem:[%s2177_s0 + $0x114] sm:$0xf]  ;;  %v1191_v40 = vor.u32 %v1439_v34, %v1190_v33  ;;  %v1070_v43 = vld [vmem:[%s2177_s0 + $0x20] sm:$0xf] }
   0xc   :  { %v1192_v38 = vld [vmem:[%s2177_s0 + $0x118] sm:$0xf0]  ;;  %v1067_v41 = vor.u32 %v1406_v35, %v1064_v36  ;;  %v1409_v44 = vld [vmem:[%s2177_s0 + $0x24] sm:$0xf0]  ;;  %v1198_v45 = vld [vmem:[%s2177_s0 + $0x120] sm:$0xf] }
   0xd   :  { %v1195_v42 = vor.u32 %v1438_v37, %v1192_v38  ;;  %v1441_v46 = vld [vmem:[%s2177_s0 + $0x124] sm:$0xf0]  ;;  %v1408_v47 = vld [vmem:[%s2177_s0 + $0x24] sm:$0xf]  ;;  %v1072_v48 = vld [vmem:[%s2177_s0 + $0x28] sm:$0xf0]  ;;  %v1071_v51 = vor.u32 %v1409_v44, %v1070_v43 }
   0xe   :  { %765 = vmatpush.bf16.msra.mxu1 %v1481_v8  ;;  %1541 = vmatpush.bf16.msra.mxu3 %v1481_v8  ;;  %v1440_v49 = vld [vmem:[%s2177_s0 + $0x124] sm:$0xf]  ;;  %v1200_v50 = vld [vmem:[%s2177_s0 + $0x128] sm:$0xf0]  ;;  %v1199_v52 = vor.u32 %v1441_v46, %v1198_v45  ;;  %v1075_v53 = vor.u32 %v1408_v47, %v1072_v48  ;;  %v1078_v55 = vld [vmem:[%s2177_s0 + $0x30] sm:$0xf] }
   0xf   :  { %597 = vmatpush.bf16.msra.mxu0 %v1472_v9  ;;  %1534 = vmatpush.bf16.msra.mxu2 %v1472_v9  ;;  %v1203_v54 = vor.u32 %v1440_v49, %v1200_v50  ;;  %v1411_v56 = vld [vmem:[%s2177_s0 + $0x34] sm:$0xf0]  ;;  %v1206_v57 = vld [vmem:[%s2177_s0 + $0x130] sm:$0xf]  ;;  %v1410_v59 = vld [vmem:[%s2177_s0 + $0x34] sm:$0xf] }
  0x10   :  { %v1443_v58 = vld [vmem:[%s2177_s0 + $0x134] sm:$0xf0]  ;;  %v1080_v60 = vld [vmem:[%s2177_s0 + $0x38] sm:$0xf0]  ;;  %v1442_v61 = vld [vmem:[%s2177_s0 + $0x134] sm:$0xf]  ;;  %v1079_v63 = vor.u32 %v1411_v56, %v1078_v55 }
  0x11   :  { %v1208_v62 = vld [vmem:[%s2177_s0 + $0x138] sm:$0xf0]  ;;  %v1207_v0 = vor.u32 %v1443_v58, %v1206_v57  ;;  %v1083_v1 = vor.u32 %v1410_v59, %v1080_v60  ;;  %v1086_v3 = vld [vmem:[%s2177_s0 + $0x40] sm:$0xf]  ;;  %v1413_v4 = vld [vmem:[%s2177_s0 + $0x44] sm:$0xf0] }
  0x12   :  { %766 = vmatpush.bf16.msra.mxu1 %v1480_v10  ;;  %1542 = vmatpush.bf16.msra.mxu3 %v1480_v10  ;;  %v1211_v2 = vor.u32 %v1442_v61, %v1208_v62  ;;  %v1214_v5 = vld [vmem:[%s2177_s0 + $0x140] sm:$0xf]  ;;  %v1445_v6 = vld [vmem:[%s2177_s0 + $0x144] sm:$0xf0]  ;;  %v1412_v7 = vld [vmem:[%s2177_s0 + $0x44] sm:$0xf] }
  0x13   :  { %598 = vmatpush.bf16.msra.mxu0 %v1471_v11  ;;  %1535 = vmatpush.bf16.msra.mxu2 %v1471_v11  ;;  %v1088_v8 = vld [vmem:[%s2177_s0 + $0x48] sm:$0xf0]  ;;  %v1444_v9 = vld [vmem:[%s2177_s0 + $0x144] sm:$0xf]  ;;  %v1087_v11 = vor.u32 %v1413_v4, %v1086_v3  ;;  %v1447_v18 = vld [vmem:[%s2177_s0 + $0x154] sm:$0xf0] }
  0x14   :  { %v1216_v10 = vld [vmem:[%s2177_s0 + $0x148] sm:$0xf0]  ;;  %v1414_v19 = vld [vmem:[%s2177_s0 + $0x54] sm:$0xf]  ;;  %v1096_v20 = vld [vmem:[%s2177_s0 + $0x58] sm:$0xf0] }
  0x15   :  { %v1446_v21 = vld [vmem:[%s2177_s0 + $0x154] sm:$0xf]  ;;  %v1099_v25 = vor.u32 %v1414_v19, %v1096_v20  ;;  %v1416_v31 = vld [vmem:[%s2177_s0 + $0x64] sm:$0xf]  ;;  %v1104_v32 = vld [vmem:[%s2177_s0 + $0x68] sm:$0xf0] }
  0x16   :  { %767 = vmatpush.bf16.msra.mxu1 %v1479_v12  ;;  %1543 = vmatpush.bf16.msra.mxu3 %v1479_v12  ;;  %v1215_v12 = vor.u32 %v1445_v6, %v1214_v5  ;;  %v1448_v33 = vld [vmem:[%s2177_s0 + $0x164] sm:$0xf]  ;;  %v1232_v34 = vld [vmem:[%s2177_s0 + $0x168] sm:$0xf0]  ;;  %v1107_v37 = vor.u32 %v1416_v31, %v1104_v32  ;;  %v1418_v43 = vld [vmem:[%s2177_s0 + $0x74] sm:$0xf] }
  0x17   :  { %599 = vmatpush.bf16.msra.mxu0 %v1470_v13  ;;  %1536 = vmatpush.bf16.msra.mxu2 %v1470_v13  ;;  %v1091_v13 = vor.u32 %v1412_v7, %v1088_v8  ;;  %v1235_v38 = vor.u32 %v1448_v33, %v1232_v34  ;;  %v1112_v44 = vld [vmem:[%s2177_s0 + $0x78] sm:$0xf0]  ;;  %v1450_v45 = vld [vmem:[%s2177_s0 + $0x174] sm:$0xf]  ;;  %v1420_v55 = vld [vmem:[%s2177_s0 + $0x84] sm:$0xf] }
  0x18   :  { %v1240_v46 = vld [vmem:[%s2177_s0 + $0x178] sm:$0xf0]  ;;  %v1115_v49 = vor.u32 %v1418_v43, %v1112_v44  ;;  %v1120_v56 = vld [vmem:[%s2177_s0 + $0x88] sm:$0xf0]  ;;  %v1452_v57 = vld [vmem:[%s2177_s0 + $0x184] sm:$0xf] }
  0x19   :  { %v1243_v50 = vor.u32 %v1450_v45, %v1240_v46  ;;  %v1248_v58 = vld [vmem:[%s2177_s0 + $0x188] sm:$0xf0]  ;;  %v1123_v62 = vor.u32 %v1420_v55, %v1120_v56  ;;  %v1126_v8 = vld [vmem:[%s2177_s0 + $0x90] sm:$0xf]  ;;  %v1134_v32 = vld [vmem:[%s2177_s0 + $0xa0] sm:$0xf] }
  0x1a   :  { %768 = vmatpush.bf16.msra.mxu1 %v1478_v14  ;;  %1544 = vmatpush.bf16.msra.mxu3 %v1478_v14  ;;  %v1219_v14 = vor.u32 %v1444_v9, %v1216_v10  ;;  %v1423_v9 = vld [vmem:[%s2177_s0 + $0x94] sm:$0xf0]  ;;  %v1254_v10 = vld [vmem:[%s2177_s0 + $0x190] sm:$0xf]  ;;  %v1425_v33 = vld [vmem:[%s2177_s0 + $0xa4] sm:$0xf0] }
  0x1b   :  { %600 = vmatpush.bf16.msra.mxu0 %v1469_v15  ;;  %1537 = vmatpush.bf16.msra.mxu2 %v1469_v15  ;;  %v1094_v15 = vld [vmem:[%s2177_s0 + $0x50] sm:$0xf]  ;;  %v1262_v34 = vld [vmem:[%s2177_s0 + $0x1a0] sm:$0xf] }
  0x1c   :  { %v1142_v56 = vld [vmem:[%s2177_s0 + $0xb0] sm:$0xf] }
  0x1e   :  { %769 = vmatpush.bf16.msra.mxu1 %v1477_v16  ;;  %1545 = vmatpush.bf16.msra.mxu3 %v1477_v16  ;;  %v1415_v16 = vld [vmem:[%s2177_s0 + $0x54] sm:$0xf0] }
  0x1f   :  { %601 = vmatpush.bf16.msra.mxu0 %v1468_v17  ;;  %1538 = vmatpush.bf16.msra.mxu2 %v1468_v17  ;;  %v1222_v17 = vld [vmem:[%s2177_s0 + $0x150] sm:$0xf]  ;;  %v1095_v23 = vor.u32 %v1415_v16, %v1094_v15  ;;  %v1454_v15 = vld [vmem:[%s2177_s0 + $0x194] sm:$0xf]  ;;  %v1256_v16 = vld [vmem:[%s2177_s0 + $0x198] sm:$0xf0] }
  0x20   :  { %v1223_v24 = vor.u32 %v1447_v18, %v1222_v17  ;;  %v1127_v17 = vor.u32 %v1423_v9, %v1126_v8 }
  0x22   :  { %770 = vmatpush.bf16.msra.mxu1 %v1476_v22  ;;  %1546 = vmatpush.bf16.msra.mxu3 %v1476_v22  ;;  %v1224_v22 = vld [vmem:[%s2177_s0 + $0x158] sm:$0xf0] }
  0x23   :  { %602 = vmatmul.bf16.vlgmr.msra.gmra.mxu0 %v1055_v27  ;;  %682 = vmatmul.bf16.vlgmr.msra.gmra.mxu2 %v1183_v28  ;;  %v1227_v26 = vor.u32 %v1446_v21, %v1224_v22  ;;  %v1102_v27 = vld [vmem:[%s2177_s0 + $0x60] sm:$0xf]  ;;  %v1417_v28 = vld [vmem:[%s2177_s0 + $0x64] sm:$0xf0] }
  0x24   :  { %v1103_v35 = vor.u32 %v1417_v28, %v1102_v27 }
  0x25   :  { %1372 = vmatmul.msk.bf16.vlgmr.msra.gmra.mxu1 %vm493_vm1, %v1059_v29  ;;  %1388 = vmatmul.msk.bf16.vlgmr.msra.gmra.mxu3 %vm493_vm1, %v1187_v30  ;;  %v1230_v29 = vld [vmem:[%s2177_s0 + $0x160] sm:$0xf]  ;;  %v1449_v30 = vld [vmem:[%s2177_s0 + $0x164] sm:$0xf0] }
  0x26   :  { %v1231_v36 = vor.u32 %v1449_v30, %v1230_v29 }
  0x33   :  { %607 = vmatmul.bf16.gmra.mxu0 %v1063_v39  ;;  %687 = vmatmul.bf16.gmra.mxu2 %v1191_v40  ;;  %v1110_v39 = vld [vmem:[%s2177_s0 + $0x70] sm:$0xf]  ;;  %v1419_v40 = vld [vmem:[%s2177_s0 + $0x74] sm:$0xf0] }
  0x34   :  { %v1111_v47 = vor.u32 %v1419_v40, %v1110_v39  ;;  %v1456_v39 = vld [vmem:[%s2177_s0 + $0x1a4] sm:$0xf]  ;;  %v1264_v40 = vld [vmem:[%s2177_s0 + $0x1a8] sm:$0xf0] }
  0x35   :  { %1373 = vmatmul.msk.bf16.gmra.mxu1 %vm493_vm1, %v1067_v41  ;;  %1389 = vmatmul.msk.bf16.gmra.mxu3 %vm493_vm1, %v1195_v42  ;;  %v1238_v41 = vld [vmem:[%s2177_s0 + $0x170] sm:$0xf]  ;;  %v1451_v42 = vld [vmem:[%s2177_s0 + $0x174] sm:$0xf0] }
  0x36   :  { %v1239_v48 = vor.u32 %v1451_v42, %v1238_v41  ;;  %v1135_v41 = vor.u32 %v1425_v33, %v1134_v32 }
  0x43   :  { %612 = vmatmul.bf16.gmra.mxu0 %v1071_v51  ;;  %692 = vmatmul.bf16.gmra.mxu2 %v1199_v52  ;;  %v1118_v51 = vld [vmem:[%s2177_s0 + $0x80] sm:$0xf]  ;;  %v1421_v52 = vld [vmem:[%s2177_s0 + $0x84] sm:$0xf0] }
  0x44   :  { %v1119_v59 = vor.u32 %v1421_v52, %v1118_v51 }
  0x45   :  { %1374 = vmatmul.msk.bf16.gmra.mxu1 %vm493_vm1, %v1075_v53  ;;  %1390 = vmatmul.msk.bf16.gmra.mxu3 %vm493_vm1, %v1203_v54  ;;  %v1246_v53 = vld [vmem:[%s2177_s0 + $0x180] sm:$0xf]  ;;  %v1453_v54 = vld [vmem:[%s2177_s0 + $0x184] sm:$0xf0] }
  0x46   :  { %v1247_v60 = vor.u32 %v1453_v54, %v1246_v53 }
  0x53   :  { %617 = vmatmul.bf16.gmra.mxu0 %v1079_v63  ;;  %697 = vmatmul.bf16.gmra.mxu2 %v1207_v0  ;;  %v1251_v63 = vor.u32 %v1452_v57, %v1248_v58  ;;  %v1427_v57 = vld [vmem:[%s2177_s0 + $0xb4] sm:$0xf0]  ;;  %v1270_v58 = vld [vmem:[%s2177_s0 + $0x1b0] sm:$0xf] }
  0x55   :  { %1375 = vmatmul.msk.bf16.gmra.mxu1 %vm493_vm1, %v1083_v1  ;;  %1391 = vmatmul.msk.bf16.gmra.mxu3 %vm493_vm1, %v1211_v2 }
  0x63   :  { %622 = vmatmul.bf16.gmra.mxu0 %v1087_v11  ;;  %702 = vmatmul.bf16.gmra.mxu2 %v1215_v12  ;;  %v1455_v11 = vld [vmem:[%s2177_s0 + $0x194] sm:$0xf0]  ;;  %v1422_v12 = vld [vmem:[%s2177_s0 + $0x94] sm:$0xf] }
  0x64   :  { %v1255_v18 = vor.u32 %v1455_v11, %v1254_v10 }
  0x65   :  { %1376 = vmatmul.msk.bf16.gmra.mxu1 %vm493_vm1, %v1091_v13  ;;  %1392 = vmatmul.msk.bf16.gmra.mxu3 %vm493_vm1, %v1219_v14  ;;  %v1128_v14 = vld [vmem:[%s2177_s0 + $0x98] sm:$0xf0] }
  0x66   :  { %v1131_v22 = vor.u32 %v1422_v12, %v1128_v14 }
  0x73   :  { %627 = vmatmul.bf16.gmra.mxu0 %v1095_v23  ;;  %707 = vmatmul.bf16.gmra.mxu2 %v1223_v24  ;;  %v1259_v23 = vor.u32 %v1454_v15, %v1256_v16 }
  0x75   :  { %1377 = vmatmul.msk.bf16.gmra.mxu1 %vm493_vm1, %v1099_v25  ;;  %1393 = vmatmul.msk.bf16.gmra.mxu3 %vm493_vm1, %v1227_v26 }
  0x83   :  { %632 = vmatmul.bf16.gmra.mxu0 %v1103_v35  ;;  %712 = vmatmul.bf16.gmra.mxu2 %v1231_v36  ;;  %v1457_v35 = vld [vmem:[%s2177_s0 + $0x1a4] sm:$0xf0]  ;;  %v1424_v36 = vld [vmem:[%s2177_s0 + $0xa4] sm:$0xf] }
  0x84   :  { %v1263_v42 = vor.u32 %v1457_v35, %v1262_v34 }
  0x85   :  { %1378 = vmatmul.msk.bf16.gmra.mxu1 %vm493_vm1, %v1107_v37  ;;  %1394 = vmatmul.msk.bf16.gmra.mxu3 %vm493_vm1, %v1235_v38  ;;  %v1136_v38 = vld [vmem:[%s2177_s0 + $0xa8] sm:$0xf0] }
  0x86   :  { %v1139_v46 = vor.u32 %v1424_v36, %v1136_v38 }
  0x93   :  { %637 = vmatmul.bf16.gmra.mxu0 %v1111_v47  ;;  %717 = vmatmul.bf16.gmra.mxu2 %v1239_v48  ;;  %v1267_v47 = vor.u32 %v1456_v39, %v1264_v40 }
  0x95   :  { %1379 = vmatmul.msk.bf16.gmra.mxu1 %vm493_vm1, %v1115_v49  ;;  %1395 = vmatmul.msk.bf16.gmra.mxu3 %vm493_vm1, %v1243_v50 }
  0xa0   :  { %v603_v61 = vpop.f32.mrf.mxu0 }
  0xa2   :  { %v772_v0 = vpop.f32.mrf.mxu1 }
  0xa3   :  { %v1851_v1 = vadd.f32 %v772_v0, %v603_v61  ;;  %642 = vmatmul.bf16.gmra.mxu0 %v1119_v59  ;;  %722 = vmatmul.bf16.gmra.mxu2 %v1247_v60  ;;  %v1459_v59 = vld [vmem:[%s2177_s0 + $0x1b4] sm:$0xf0]  ;;  %v1426_v60 = vld [vmem:[%s2177_s0 + $0xb4] sm:$0xf]  ;;  %v1272_v0 = vld [vmem:[%s2177_s0 + $0x1b8] sm:$0xf0] }
  0xa5   :  { %1380 = vmatmul.msk.bf16.gmra.mxu1 %vm493_vm1, %v1123_v62  ;;  %1396 = vmatmul.msk.bf16.gmra.mxu3 %vm493_vm1, %v1251_v63  ;;  %v1144_v62 = vld [vmem:[%s2177_s0 + $0xb8] sm:$0xf0]  ;;  %v1458_v63 = vld [vmem:[%s2177_s0 + $0x1b4] sm:$0xf] }
  0xa6   :  { %v683_v2 = vpop.f32.mrf.mxu2  ;;  %v1147_v9 = vor.u32 %v1426_v60, %v1144_v62  ;;  %v1275_v10 = vor.u32 %v1458_v63, %v1272_v0 }
  0xa8   :  { %v852_v3 = vpop.f32.mrf.mxu3  ;;  %v605_v4 = vpop.f32.mrf.mxu0 }
  0xa9   :  { %v1855_v5 = vadd.f32 %v852_v3, %v683_v2  ;;  %v1143_v2 = vor.u32 %v1427_v57, %v1142_v56  ;;  %v1271_v3 = vor.u32 %v1459_v59, %v1270_v58  ;;  %v1160_v57 = vld [vmem:[%s2177_s0 + $0xd8] sm:$0xf0]  ;;  %v1462_v58 = vld [vmem:[%s2177_s0 + $0x1d4] sm:$0xf] }
  0xaa   :  { %v774_v6 = vpop.f32.mrf.mxu1  ;;  %v1288_v59 = vld [vmem:[%s2177_s0 + $0x1d8] sm:$0xf0] }
  0xab   :  { %v1857_v7 = vadd.f32 %v774_v6, %v605_v4 }
  0xae   :  { %v685_v13 = vpop.f32.mrf.mxu2 }
  0xb0   :  { %v854_v19 = vpop.f32.mrf.mxu3  ;;  %v608_v20 = vpop.f32.mrf.mxu0 }
  0xb1   :  { %v1883_v21 = vadd.f32 %v854_v19, %v685_v13  ;;  %v1150_v19 = vld [vmem:[%s2177_s0 + $0xc0] sm:$0xf] }
  0xb2   :  { %v777_v24 = vpop.f32.mrf.mxu1 }
  0xb3   :  { %v1885_v25 = vadd.f32 %v777_v24, %v608_v20  ;;  %647 = vmatmul.bf16.gmra.mxu0 %v1127_v17  ;;  %727 = vmatmul.bf16.gmra.mxu2 %v1255_v18  ;;  %v1429_v20 = vld [vmem:[%s2177_s0 + $0xc4] sm:$0xf0]  ;;  %v1428_v24 = vld [vmem:[%s2177_s0 + $0xc4] sm:$0xf] }
  0xb4   :  { %v1151_v32 = vor.u32 %v1429_v20, %v1150_v19  ;;  %v1433_v19 = vld [vmem:[%s2177_s0 + $0xe4] sm:$0xf0]  ;;  %v1294_v20 = vld [vmem:[%s2177_s0 + $0x1e0] sm:$0xf] }
  0xb5   :  { %1381 = vmatmul.msk.bf16.gmra.mxu1 %vm493_vm1, %v1131_v22  ;;  %1397 = vmatmul.msk.bf16.gmra.mxu3 %vm493_vm1, %v1259_v23  ;;  %v1278_v22 = vld [vmem:[%s2177_s0 + $0x1c0] sm:$0xf]  ;;  %v1461_v23 = vld [vmem:[%s2177_s0 + $0x1c4] sm:$0xf0] }
  0xb6   :  { %v688_v26 = vpop.f32.mrf.mxu2  ;;  %v1279_v33 = vor.u32 %v1461_v23, %v1278_v22  ;;  %v1465_v22 = vld [vmem:[%s2177_s0 + $0x1e4] sm:$0xf0]  ;;  %v1432_v23 = vld [vmem:[%s2177_s0 + $0xe4] sm:$0xf] }
  0xb8   :  { %v857_v27 = vpop.f32.mrf.mxu3  ;;  %v610_v28 = vpop.f32.mrf.mxu0 }
  0xb9   :  { %v1889_v29 = vadd.f32 %v857_v27, %v688_v26  ;;  %v1152_v27 = vld [vmem:[%s2177_s0 + $0xc8] sm:$0xf0] }
  0xba   :  { %v779_v30 = vpop.f32.mrf.mxu1 }
  0xbb   :  { %v1891_v31 = vadd.f32 %v779_v30, %v610_v28  ;;  %v1460_v28 = vld [vmem:[%s2177_s0 + $0x1c4] sm:$0xf]  ;;  %v1280_v30 = vld [vmem:[%s2177_s0 + $0x1c8] sm:$0xf0] }
  0xbc   :  { %v1283_v38 = vor.u32 %v1460_v28, %v1280_v30  ;;  %v1296_v28 = vld [vmem:[%s2177_s0 + $0x1e8] sm:$0xf0] }
  0xbe   :  { %v690_v37 = vpop.f32.mrf.mxu2 }
  0xc0   :  { %v859_v43 = vpop.f32.mrf.mxu3  ;;  %v613_v44 = vpop.f32.mrf.mxu0 }
  0xc1   :  { %v1917_v45 = vadd.f32 %v859_v43, %v690_v37  ;;  %v1155_v37 = vor.u32 %v1428_v24, %v1152_v27  ;;  %v1464_v27 = vld [vmem:[%s2177_s0 + $0x1e4] sm:$0xf] }
  0xc2   :  { %v782_v48 = vpop.f32.mrf.mxu1 }
  0xc3   :  { %v1919_v49 = vadd.f32 %v782_v48, %v613_v44  ;;  %652 = vmatmul.bf16.gmra.mxu0 %v1135_v41  ;;  %732 = vmatmul.bf16.gmra.mxu2 %v1263_v42  ;;  %v1158_v48 = vld [vmem:[%s2177_s0 + $0xd0] sm:$0xf] }
  0xc5   :  { %1382 = vmatmul.msk.bf16.gmra.mxu1 %vm493_vm1, %v1139_v46  ;;  %1398 = vmatmul.msk.bf16.gmra.mxu3 %vm493_vm1, %v1267_v47 }
  0xc6   :  { %v693_v50 = vpop.f32.mrf.mxu2 }
  0xc8   :  { %v862_v51 = vpop.f32.mrf.mxu3  ;;  %v615_v52 = vpop.f32.mrf.mxu0 }
  0xc9   :  { %v1923_v53 = vadd.f32 %v862_v51, %v693_v50  ;;  %v1431_v50 = vld [vmem:[%s2177_s0 + $0xd4] sm:$0xf0]  ;;  %v1286_v51 = vld [vmem:[%s2177_s0 + $0x1d0] sm:$0xf] }
  0xca   :  { %v784_v54 = vpop.f32.mrf.mxu1  ;;  %v1159_v60 = vor.u32 %v1431_v50, %v1158_v48 }
  0xcb   :  { %v1925_v55 = vadd.f32 %v784_v54, %v615_v52  ;;  %v1463_v52 = vld [vmem:[%s2177_s0 + $0x1d4] sm:$0xf0]  ;;  %v1430_v54 = vld [vmem:[%s2177_s0 + $0xd4] sm:$0xf] }
  0xce   :  { %v695_v61 = vpop.f32.mrf.mxu2 }
  0xd0   :  { %v864_v4 = vpop.f32.mrf.mxu3  ;;  %v618_v6 = vpop.f32.mrf.mxu0 }
  0xd1   :  { %v1951_v8 = vadd.f32 %v864_v4, %v695_v61  ;;  %v1287_v61 = vor.u32 %v1463_v52, %v1286_v51  ;;  %v1174_v52 = vld [vmem:[%s2177_s0 + $0xf0] sm:$0xf] }
  0xd2   :  { %v787_v11 = vpop.f32.mrf.mxu1 }
  0xd3   :  { %v1953_v12 = vadd.f32 %v787_v11, %v618_v6  ;;  %657 = vmatmul.bf16.gmra.mxu0 %v1143_v2  ;;  %737 = vmatmul.bf16.gmra.mxu2 %v1271_v3  ;;  %v1163_v2 = vor.u32 %v1430_v54, %v1160_v57  ;;  %v1291_v3 = vor.u32 %v1462_v58, %v1288_v59  ;;  %v1435_v54 = vld [vmem:[%s2177_s0 + $0xf4] sm:$0xf0]  ;;  %v1434_v58 = vld [vmem:[%s2177_s0 + $0xf4] sm:$0xf] }
  0xd4   :  { %v1467_v57 = vld [vmem:[%s2177_s0 + $0x1f4] sm:$0xf0] }
  0xd5   :  { %1383 = vmatmul.msk.bf16.gmra.mxu1 %vm493_vm1, %v1147_v9  ;;  %1399 = vmatmul.msk.bf16.gmra.mxu3 %vm493_vm1, %v1275_v10 }
  0xd6   :  { %v698_v13 = vpop.f32.mrf.mxu2 }
  0xd8   :  { %v867_v14 = vpop.f32.mrf.mxu3  ;;  %v620_v15 = vpop.f32.mrf.mxu0 }
  0xd9   :  { %v1957_v16 = vadd.f32 %v867_v14, %v698_v13 }
  0xda   :  { %v789_v17 = vpop.f32.mrf.mxu1 }
  0xdb   :  { %v1959_v18 = vadd.f32 %v789_v17, %v620_v15  ;;  %v1166_v17 = vld [vmem:[%s2177_s0 + $0xe0] sm:$0xf] }
  0xdc   :  { %v1167_v30 = vor.u32 %v1433_v19, %v1166_v17 }
  0xde   :  { %v700_v26 = vpop.f32.mrf.mxu2 }
  0xe0   :  { %v869_v34 = vpop.f32.mrf.mxu3  ;;  %v623_v35 = vpop.f32.mrf.mxu0 }
  0xe1   :  { %v1985_v36 = vadd.f32 %v869_v34, %v700_v26  ;;  %v1168_v26 = vld [vmem:[%s2177_s0 + $0xe8] sm:$0xf0] }
  0xe2   :  { %v792_v39 = vpop.f32.mrf.mxu1 }
  0xe3   :  { %v1987_v40 = vadd.f32 %v792_v39, %v623_v35  ;;  %662 = vmatmul.bf16.gmra.mxu0 %v1151_v32  ;;  %742 = vmatmul.bf16.gmra.mxu2 %v1279_v33  ;;  %v1295_v32 = vor.u32 %v1465_v22, %v1294_v20 }
  0xe5   :  { %1384 = vmatmul.msk.bf16.gmra.mxu1 %vm493_vm1, %v1155_v37  ;;  %1400 = vmatmul.msk.bf16.gmra.mxu3 %vm493_vm1, %v1283_v38  ;;  %v1171_v37 = vor.u32 %v1432_v23, %v1168_v26  ;;  %v1299_v38 = vor.u32 %v1464_v27, %v1296_v28 }
  0xe6   :  { %v703_v41 = vpop.f32.mrf.mxu2 }
  0xe8   :  { %v872_v42 = vpop.f32.mrf.mxu3  ;;  %v625_v43 = vpop.f32.mrf.mxu0 }
  0xe9   :  { %v1991_v44 = vadd.f32 %v872_v42, %v703_v41 }
  0xea   :  { %v794_v46 = vpop.f32.mrf.mxu1 }
  0xeb   :  { %v1993_v47 = vadd.f32 %v794_v46, %v625_v43 }
  0xee   :  { %v705_v56 = vpop.f32.mrf.mxu2 }
  0xf0   :  { %v874_v62 = vpop.f32.mrf.mxu3  ;;  %v628_v63 = vpop.f32.mrf.mxu0 }
  0xf1   :  { %v2019_v0 = vadd.f32 %v874_v62, %v705_v56  ;;  %v1302_v56 = vld [vmem:[%s2177_s0 + $0x1f0] sm:$0xf]  ;;  %v1304_v62 = vld [vmem:[%s2177_s0 + $0x1f8] sm:$0xf0] }
  0xf2   :  { %v797_v4 = vpop.f32.mrf.mxu1 }
  0xf3   :  { %v2021_v6 = vadd.f32 %v797_v4, %v628_v63  ;;  %667 = vmatmul.bf16.gmra.mxu0 %v1159_v60  ;;  %747 = vmatmul.bf16.gmra.mxu2 %v1287_v61  ;;  %v1176_v60 = vld [vmem:[%s2177_s0 + $0xf8] sm:$0xf0]  ;;  %v1466_v61 = vld [vmem:[%s2177_s0 + $0x1f4] sm:$0xf]  ;;  %v1175_v63 = vor.u32 %v1435_v54, %v1174_v52 }
  0xf5   :  { %1385 = vmatmul.msk.bf16.gmra.mxu1 %vm493_vm1, %v1163_v2  ;;  %1401 = vmatmul.msk.bf16.gmra.mxu3 %vm493_vm1, %v1291_v3  ;;  %v1303_v2 = vor.u32 %v1467_v57, %v1302_v56 }
  0xf6   :  { %v708_v9 = vpop.f32.mrf.mxu2 }
  0xf8   :  { %v877_v10 = vpop.f32.mrf.mxu3  ;;  %v630_v11 = vpop.f32.mrf.mxu0 }
  0xf9   :  { %v2025_v13 = vadd.f32 %v877_v10, %v708_v9  ;;  %v1179_v10 = vor.u32 %v1434_v58, %v1176_v60  ;;  %v2105_v58 = vld [vmem:[%s2178_s2] ss:$0 sm:$0xff] }
  0xfa   :  { %v799_v14 = vpop.f32.mrf.mxu1 }
  0xfb   :  { %v2027_v15 = vadd.f32 %v799_v14, %v630_v11  ;;  %v1307_v11 = vor.u32 %v1466_v61, %v1304_v62 }
  0xfe   :  { %v710_v24 = vpop.f32.mrf.mxu2 }
 0x100   :  { %v879_v33 = vpop.f32.mrf.mxu3  ;;  %v633_v34 = vpop.f32.mrf.mxu0 }
 0x101   :  { %v2053_v35 = vadd.f32 %v879_v33, %v710_v24 }
 0x102   :  { %v802_v39 = vpop.f32.mrf.mxu1 }
 0x103   :  { %v2055_v41 = vadd.f32 %v802_v39, %v633_v34  ;;  %672 = vmatmul.bf16.gmra.mxu0 %v1167_v30  ;;  %752 = vmatmul.bf16.gmra.mxu2 %v1295_v32 }
 0x105   :  { %1386 = vmatmul.msk.bf16.gmra.mxu1 %vm493_vm1, %v1171_v37  ;;  %1402 = vmatmul.msk.bf16.gmra.mxu3 %vm493_vm1, %v1299_v38 }
 0x106   :  { %v713_v42 = vpop.f32.mrf.mxu2 }
 0x108   :  { %v882_v43 = vpop.f32.mrf.mxu3  ;;  %v635_v46 = vpop.f32.mrf.mxu0 }
 0x109   :  { %v2059_v48 = vadd.f32 %v882_v43, %v713_v42 }
 0x10a   :  { %v804_v50 = vpop.f32.mrf.mxu1 }
 0x10b   :  { %v2061_v51 = vadd.f32 %v804_v50, %v635_v46 }
 0x10e   :  { %v715_v59 = vpop.f32.mrf.mxu2 }
 0x110   :  { %v884_v3 = vpop.f32.mrf.mxu3  ;;  %v638_v4 = vpop.f32.mrf.mxu0 }
 0x111   :  { %v2087_v9 = vadd.f32 %v884_v3, %v715_v59 }
 0x112   :  { %v807_v14 = vpop.f32.mrf.mxu1 }
 0x113   :  { %v2089_v17 = vadd.f32 %v807_v14, %v638_v4  ;;  %677 = vmatmul.bf16.gmra.mxu0 %v1175_v63  ;;  %757 = vmatmul.bf16.gmra.mxu2 %v1303_v2 }
 0x115   :  { %1387 = vmatmul.msk.bf16.gmra.mxu1 %vm493_vm1, %v1179_v10  ;;  %1403 = vmatmul.msk.bf16.gmra.mxu3 %vm493_vm1, %v1307_v11 }
 0x116   :  { %v718_v19 = vpop.f32.mrf.mxu2 }
 0x118   :  { %v887_v20 = vpop.f32.mrf.mxu3  ;;  %v640_v22 = vpop.f32.mrf.mxu0 }
 0x119   :  { %v2093_v23 = vadd.f32 %v887_v20, %v718_v19 }
 0x11a   :  { %v809_v24 = vpop.f32.mrf.mxu1 }
 0x11b   :  { %v2095_v26 = vadd.f32 %v809_v24, %v640_v22 }
 0x11e   :  { %v720_v27 = vpop.f32.mrf.mxu2 }
 0x120   :  { %v889_v28 = vpop.f32.mrf.mxu3  ;;  %v643_v30 = vpop.f32.mrf.mxu0 }
 0x121   :  { %v2097_v32 = vadd.f32 %v889_v28, %v720_v27 }
 0x122   :  { %v812_v33 = vpop.f32.mrf.mxu1 }
 0x123   :  { %v813_v34 = vadd.f32 %v812_v33, %v643_v30 }
 0x125   :  { %v932_v37 = vmax.f32 %v1851_v1, %v813_v34 }
 0x126   :  { %v723_v38 = vpop.f32.mrf.mxu2 }
 0x127   :  { %v933_v39 = vmax.f32 %v932_v37, %v1855_v5 }
 0x128   :  { %v892_v42 = vpop.f32.mrf.mxu3  ;;  %v645_v43 = vpop.f32.mrf.mxu0 }
 0x129   :  { %v893_v50 = vadd.f32 %v892_v42, %v723_v38 }
 0x12a   :  { %v814_v46 = vpop.f32.mrf.mxu1 }
 0x12b   :  { %v815_v52 = vadd.f32 %v814_v46, %v645_v43  ;;  %v934_v57 = vmax.f32 %v933_v39, %v893_v50 }
 0x12d   :  { %v935_v54 = vmax.f32 %v1857_v7, %v815_v52  ;;  %v984_v62 = vadd.f32 %v2105_v58, %v934_v57 }
 0x12e   :  { %v725_v56 = vpop.f32.mrf.mxu2 }
 0x12f   :  { %v936_v59 = vmax.f32 %v935_v54, %v1883_v21  ;;  %v1000_v10 = vmax.f32 %v984_v62, 0.0 }
 0x130   :  { %v894_v1 = vpop.f32.mrf.mxu3  ;;  %v648_v60 = vpop.f32.mrf.mxu0 }
 0x131   :  { %v895_v61 = vadd.f32 %v894_v1, %v725_v56 }
 0x132   :  { %v817_v5 = vpop.f32.mrf.mxu1 }
 0x133   :  { %v937_v63 = vmax.f32 %v936_v59, %v895_v61  ;;  %v818_v2 = vadd.f32 %v817_v5, %v648_v60 }
 0x135   :  { %v985_v3 = vadd.f32 %v2105_v58, %v937_v63  ;;  %v938_v7 = vmax.f32 %v1885_v25, %v818_v2 }
 0x136   :  { %v728_v4 = vpop.f32.mrf.mxu2 }
 0x137   :  { %v1001_v11 = vmax.f32 %v985_v3, 0.0  ;;  %v939_v14 = vmax.f32 %v938_v7, %v1889_v29 }
 0x138   :  { %v897_v19 = vpop.f32.mrf.mxu3  ;;  %v650_v20 = vpop.f32.mrf.mxu0 }
 0x139   :  { %v1487_v21 = vpack.c.bf16 %v1001_v11, %v1000_v10  ;;  %v898_v24 = vadd.f32 %v897_v19, %v728_v4 }
 0x13a   :  { %v819_v22 = vpop.f32.mrf.mxu1 }
 0x13b   :  { %1488 = vst [vmem:[%s2179_s3] sm:$0xff] %v1487_v21   ;;  %v820_v27 = vadd.f32 %v819_v22, %v650_v20  ;;  %v940_v33 = vmax.f32 %v939_v14, %v898_v24 }
 0x13d   :  { %v941_v28 = vmax.f32 %v1891_v31, %v820_v27  ;;  %v986_v39 = vadd.f32 %v2105_v58, %v940_v33 }
 0x13e   :  { %v730_v30 = vpop.f32.mrf.mxu2 }
 0x13f   :  { %v942_v25 = vmax.f32 %v941_v28, %v1917_v45  ;;  %v1002_v54 = vmax.f32 %v986_v39, 0.0 }
 0x140   :  { %v899_v34 = vpop.f32.mrf.mxu3  ;;  %v653_v37 = vpop.f32.mrf.mxu0 }
 0x141   :  { %v900_v38 = vadd.f32 %v899_v34, %v730_v30 }
 0x142   :  { %v822_v29 = vpop.f32.mrf.mxu1 }
 0x143   :  { %v943_v42 = vmax.f32 %v942_v25, %v900_v38  ;;  %v823_v43 = vadd.f32 %v822_v29, %v653_v37 }
 0x145   :  { %v987_v46 = vadd.f32 %v2105_v58, %v943_v42  ;;  %v944_v50 = vmax.f32 %v1919_v49, %v823_v43 }
 0x146   :  { %v733_v52 = vpop.f32.mrf.mxu2 }
 0x147   :  { %v1003_v56 = vmax.f32 %v987_v46, 0.0  ;;  %v945_v31 = vmax.f32 %v944_v50, %v1923_v53 }
 0x148   :  { %v902_v57 = vpop.f32.mrf.mxu3  ;;  %v655_v59 = vpop.f32.mrf.mxu0 }
 0x149   :  { %v1492_v45 = vpack.c.bf16 %v1003_v56, %v1002_v54  ;;  %v903_v60 = vadd.f32 %v902_v57, %v733_v52 }
 0x14a   :  { %v824_v1 = vpop.f32.mrf.mxu1 }
 0x14b   :  { %1524 = vst [vmem:[%s2179_s3 + $0x8] sm:$0xff] %v1492_v45   ;;  %v825_v61 = vadd.f32 %v824_v1, %v655_v59  ;;  %v946_v63 = vmax.f32 %v945_v31, %v903_v60 }
 0x14d   :  { %v947_v5 = vmax.f32 %v1925_v55, %v825_v61  ;;  %v988_v4 = vadd.f32 %v2105_v58, %v946_v63 }
 0x14e   :  { %v735_v62 = vpop.f32.mrf.mxu2 }
 0x14f   :  { %v948_v49 = vmax.f32 %v947_v5, %v1951_v8  ;;  %v1004_v21 = vmax.f32 %v988_v4, 0.0 }
 0x150   :  { %v904_v2 = vpop.f32.mrf.mxu3  ;;  %v658_v3 = vpop.f32.mrf.mxu0 }
 0x151   :  { %v905_v7 = vadd.f32 %v904_v2, %v735_v62 }
 0x152   :  { %v827_v53 = vpop.f32.mrf.mxu1 }
 0x153   :  { %v949_v10 = vmax.f32 %v948_v49, %v905_v7  ;;  %v828_v11 = vadd.f32 %v827_v53, %v658_v3 }
 0x155   :  { %v989_v14 = vadd.f32 %v2105_v58, %v949_v10  ;;  %v950_v19 = vmax.f32 %v1953_v12, %v828_v11 }
 0x156   :  { %v738_v20 = vpop.f32.mrf.mxu2 }
 0x157   :  { %v1005_v22 = vmax.f32 %v989_v14, 0.0  ;;  %v951_v55 = vmax.f32 %v950_v19, %v1957_v16 }
 0x158   :  { %v907_v24 = vpop.f32.mrf.mxu3  ;;  %v660_v27 = vpop.f32.mrf.mxu0 }
 0x159   :  { %v1497_v8 = vpack.c.bf16 %v1005_v22, %v1004_v21  ;;  %v908_v30 = vadd.f32 %v907_v24, %v738_v20 }
 0x15a   :  { %v829_v28 = vpop.f32.mrf.mxu1 }
 0x15b   :  { %1525 = vst [vmem:[%s2179_s3 + $0x10] sm:$0xff] %v1497_v8   ;;  %v830_v33 = vadd.f32 %v829_v28, %v660_v27  ;;  %v952_v37 = vmax.f32 %v951_v55, %v908_v30 }
 0x15d   :  { %v953_v25 = vmax.f32 %v1959_v18, %v830_v33  ;;  %v990_v42 = vadd.f32 %v2105_v58, %v952_v37 }
 0x15e   :  { %v740_v34 = vpop.f32.mrf.mxu2 }
 0x15f   :  { %v954_v12 = vmax.f32 %v953_v25, %v1985_v36  ;;  %v1006_v56 = vmax.f32 %v990_v42, 0.0 }
 0x160   :  { %v909_v38 = vpop.f32.mrf.mxu3  ;;  %v663_v29 = vpop.f32.mrf.mxu0 }
 0x161   :  { %v910_v39 = vadd.f32 %v909_v38, %v740_v34 }
 0x162   :  { %v832_v16 = vpop.f32.mrf.mxu1 }
 0x163   :  { %v955_v43 = vmax.f32 %v954_v12, %v910_v39  ;;  %v833_v46 = vadd.f32 %v832_v16, %v663_v29 }
 0x165   :  { %v991_v50 = vadd.f32 %v2105_v58, %v955_v43  ;;  %v956_v52 = vmax.f32 %v1987_v40, %v833_v46 }
 0x166   :  { %v743_v54 = vpop.f32.mrf.mxu2 }
 0x167   :  { %v1007_v31 = vmax.f32 %v991_v50, 0.0  ;;  %v957_v18 = vmax.f32 %v956_v52, %v1991_v44 }
 0x168   :  { %v912_v57 = vpop.f32.mrf.mxu3  ;;  %v665_v59 = vpop.f32.mrf.mxu0 }
 0x169   :  { %v1502_v36 = vpack.c.bf16 %v1007_v31, %v1006_v56  ;;  %v913_v1 = vadd.f32 %v912_v57, %v743_v54 }
 0x16a   :  { %v834_v45 = vpop.f32.mrf.mxu1 }
 0x16b   :  { %1526 = vst [vmem:[%s2179_s3 + $0x18] sm:$0xff] %v1502_v36   ;;  %v835_v60 = vadd.f32 %v834_v45, %v665_v59  ;;  %v958_v62 = vmax.f32 %v957_v18, %v913_v1 }
 0x16d   :  { %v959_v61 = vmax.f32 %v1993_v47, %v835_v60  ;;  %v992_v3 = vadd.f32 %v2105_v58, %v958_v62 }
 0x16e   :  { %v745_v5 = vpop.f32.mrf.mxu2 }
 0x16f   :  { %v960_v40 = vmax.f32 %v959_v61, %v2019_v0  ;;  %v1008_v14 = vmax.f32 %v992_v3, 0.0 }
 0x170   :  { %v914_v63 = vpop.f32.mrf.mxu3  ;;  %v668_v49 = vpop.f32.mrf.mxu0 }
 0x171   :  { %v915_v2 = vadd.f32 %v914_v63, %v745_v5 }
 0x172   :  { %v837_v44 = vpop.f32.mrf.mxu1 }
 0x173   :  { %v961_v7 = vmax.f32 %v960_v40, %v915_v2  ;;  %v838_v53 = vadd.f32 %v837_v44, %v668_v49 }
 0x175   :  { %v993_v4 = vadd.f32 %v2105_v58, %v961_v7  ;;  %v962_v10 = vmax.f32 %v2021_v6, %v838_v53 }
 0x176   :  { %v748_v11 = vpop.f32.mrf.mxu2 }
 0x177   :  { %v1009_v19 = vmax.f32 %v993_v4, 0.0  ;;  %v963_v47 = vmax.f32 %v962_v10, %v2025_v13 }
 0x178   :  { %v917_v20 = vpop.f32.mrf.mxu3  ;;  %v670_v21 = vpop.f32.mrf.mxu0 }
 0x179   :  { %v1507_v0 = vpack.c.bf16 %v1009_v19, %v1008_v14  ;;  %v918_v55 = vadd.f32 %v917_v20, %v748_v11 }
 0x17a   :  { %v839_v22 = vpop.f32.mrf.mxu1 }
 0x17b   :  { %1527 = vst [vmem:[%s2179_s3 + $0x20] sm:$0xff] %v1507_v0   ;;  %v840_v24 = vadd.f32 %v839_v22, %v670_v21  ;;  %v964_v28 = vmax.f32 %v963_v47, %v918_v55 }
 0x17d   :  { %v965_v27 = vmax.f32 %v2027_v15, %v840_v24  ;;  %v994_v34 = vadd.f32 %v2105_v58, %v964_v28 }
 0x17e   :  { %v750_v8 = vpop.f32.mrf.mxu2 }
 0x17f   :  { %v966_v6 = vmax.f32 %v965_v27, %v2053_v35  ;;  %v1010_v16 = vmax.f32 %v994_v34, 0.0 }
 0x180   :  { %v919_v30 = vpop.f32.mrf.mxu3  ;;  %v673_v33 = vpop.f32.mrf.mxu0 }
 0x181   :  { %v920_v25 = vadd.f32 %v919_v30, %v750_v8 }
 0x182   :  { %v842_v13 = vpop.f32.mrf.mxu1 }
 0x183   :  { %v967_v37 = vmax.f32 %v966_v6, %v920_v25  ;;  %v843_v12 = vadd.f32 %v842_v13, %v673_v33 }
 0x185   :  { %v995_v38 = vadd.f32 %v2105_v58, %v967_v37  ;;  %v968_v29 = vmax.f32 %v2055_v41, %v843_v12 }
 0x186   :  { %v753_v39 = vpop.f32.mrf.mxu2 }
 0x187   :  { %v1011_v42 = vmax.f32 %v995_v38, 0.0  ;;  %v969_v15 = vmax.f32 %v968_v29, %v2059_v48 }
 0x188   :  { %v922_v43 = vpop.f32.mrf.mxu3  ;;  %v675_v46 = vpop.f32.mrf.mxu0 }
 0x189   :  { %v1512_v35 = vpack.c.bf16 %v1011_v42, %v1010_v16  ;;  %v923_v52 = vadd.f32 %v922_v43, %v753_v39 }
 0x18a   :  { %v844_v50 = vpop.f32.mrf.mxu1 }
 0x18b   :  { %1528 = vst [vmem:[%s2179_s3 + $0x28] sm:$0xff] %v1512_v35   ;;  %v845_v54 = vadd.f32 %v844_v50, %v675_v46  ;;  %v970_v18 = vmax.f32 %v969_v15, %v923_v52 }
 0x18d   :  { %v971_v56 = vmax.f32 %v2061_v51, %v845_v54  ;;  %v996_v45 = vadd.f32 %v2105_v58, %v970_v18 }
 0x18e   :  { %v755_v31 = vpop.f32.mrf.mxu2 }
 0x18f   :  { %v972_v41 = vmax.f32 %v971_v56, %v2087_v9  ;;  %v1012_v40 = vmax.f32 %v996_v45, 0.0 }
 0x190   :  { %v924_v57 = vpop.f32.mrf.mxu3  ;;  %v678_v59 = vpop.f32.mrf.mxu0 }
 0x191   :  { %v925_v36 = vadd.f32 %v924_v57, %v755_v31 }
 0x192   :  { %v847_v48 = vpop.f32.mrf.mxu1 }
 0x193   :  { %v973_v1 = vmax.f32 %v972_v41, %v925_v36  ;;  %v848_v60 = vadd.f32 %v847_v48, %v678_v59 }
 0x195   :  { %v997_v61 = vadd.f32 %v2105_v58, %v973_v1  ;;  %v974_v5 = vmax.f32 %v2089_v17, %v848_v60 }
 0x196   :  { %v758_v62 = vpop.f32.mrf.mxu2 }
 0x197   :  { %v1013_v63 = vmax.f32 %v997_v61, 0.0  ;;  %v975_v51 = vmax.f32 %v974_v5, %v2093_v23 }
 0x198   :  { %v927_v49 = vpop.f32.mrf.mxu3  ;;  %v680_v9 = vpop.f32.mrf.mxu0 }
 0x199   :  { %v1517_v2 = vpack.c.bf16 %v1013_v63, %v1012_v40  ;;  %v928_v3 = vadd.f32 %v927_v49, %v758_v62 }
 0x19a   :  { %v849_v44 = vpop.f32.mrf.mxu1 }
 0x19b   :  { %1529 = vst [vmem:[%s2179_s3 + $0x30] sm:$0xff] %v1517_v2   ;;  %v850_v7 = vadd.f32 %v849_v44, %v680_v9  ;;  %v976_v4 = vmax.f32 %v975_v51, %v928_v3 }
 0x19d   :  { %v977_v53 = vmax.f32 %v2095_v26, %v850_v7  ;;  %v998_v23 = vadd.f32 %v2105_v58, %v976_v4 }
 0x19e   :  { %v760_v10 = vpop.f32.mrf.mxu2 }
 0x19f   :  { %v978_v17 = vmax.f32 %v977_v53, %v2097_v32  ;;  %v1014_v20 = vmax.f32 %v998_v23, 0.0 }
 0x1a0   :  { %v929_v11 = vpop.f32.mrf.mxu3 }
 0x1a1   :  { %v930_v14 = vadd.f32 %v929_v11, %v760_v10 }
 0x1a3   :  { %v979_v19 = vmax.f32 %v978_v17, %v930_v14 }
 0x1a5   :  { %v999_v47 = vadd.f32 %v2105_v58, %v979_v19 }
 0x1a7   :  { %v1015_v21 = vmax.f32 %v999_v47, 0.0 }
 0x1a9   :  { %v1522_v0 = vpack.c.bf16 %v1015_v21, %v1014_v20 }
 0x1ab   :  { %1530 = vst [vmem:[%s2179_s3 + $0x38] sm:$0xff] %v1522_v0  }

// kernel: cnn_forward.5
= control target key start
LH: loop header
LB: loop body
LE: loop exit
PB: predicated region body
PF: predicated region fallthrough
CT: control target
= control target key end

     0   :  { %vm331_vm0 = vcmask 523264   ;;  %s1103_s1 = inlined_call_operand.vmem [shape: bf16[320,128], index: 1, kind: input, shape index: {}]   ;;  %s1104_s0 = inlined_call_operand.vmem [shape: bf16[128,320], index: 0, kind: input, shape index: {}]   ;;  %s1105_s2 = inlined_call_operand.vmem [shape: f32[1,128], index: 2, kind: input, shape index: {}]   ;;  %s1106_s3 = inlined_call_operand.vmem [shape: f32[128,128], index: 3, kind: output, shape index: {}]  }
   0x1   :  { %v738_v0 = vld [vmem:[%s1103_s1 + $0x38] sm:$0xff]  ;;  %v737_v3 = vld [vmem:[%s1103_s1 + $0x30] sm:$0xff]  ;;  %v736_v6 = vld [vmem:[%s1103_s1 + $0x28] sm:$0xff] }
   0x2   :  { %v798_v1 = vld [vmem:[%s1103_s1 + $0x78] sm:$0xff]  ;;  %356 = vmatpush.bf16.msra.mxu0 %v738_v0  ;;  %751 = vmatpush.bf16.msra.mxu3 %v738_v0  ;;  %v813_v4 = vld [vmem:[%s1103_s1 + $0x70] sm:$0xff]  ;;  %v744_v7 = vld [vmem:[%s1103_s1 + $0x68] sm:$0xff] }
   0x3   :  { %v803_v2 = vld [vmem:[%s1103_s1 + $0x98] sm:$0xff]  ;;  %405 = vmatpush.bf16.msra.mxu1 %v798_v1  ;;  %v818_v5 = vld [vmem:[%s1103_s1 + $0x90] sm:$0xff]  ;;  %v831_v8 = vld [vmem:[%s1103_s1 + $0x88] sm:$0xff] }
   0x4   :  { %458 = vmatpush.bf16.msra.mxu2 %v803_v2  ;;  %v735_v9 = vld [vmem:[%s1103_s1 + $0x20] sm:$0xff]  ;;  %v533_v12 = vld [vmem:[%s1104_s0 + $0x8] sm:$0xf]  ;;  %v709_v13 = vld [vmem:[%s1104_s0 + $0x10] sm:$0xf0] }
   0x5   :  { %v743_v10 = vld [vmem:[%s1103_s1 + $0x60] sm:$0xff]  ;;  %v534_v14 = vor.u32 %v709_v13, %v533_v12  ;;  %v734_v15 = vld [vmem:[%s1103_s1 + $0x18] sm:$0xff]  ;;  %v733_v17 = vld [vmem:[%s1103_s1 + $0x10] sm:$0xff] }
   0x6   :  { %357 = vmatpush.bf16.msra.mxu0 %v737_v3  ;;  %752 = vmatpush.bf16.msra.mxu3 %v737_v3  ;;  %v843_v11 = vld [vmem:[%s1103_s1 + $0x80] sm:$0xff]  ;;  %v742_v16 = vld [vmem:[%s1103_s1 + $0x58] sm:$0xff]  ;;  %v741_v18 = vld [vmem:[%s1103_s1 + $0x50] sm:$0xff] }
   0x7   :  { %406 = vmatpush.bf16.msra.mxu1 %v813_v4  ;;  %v732_v19 = vld [vmem:[%s1103_s1 + $0x8] sm:$0xff]  ;;  %v731_v21 = vld [vmem:[%s1103_s1] sm:$0xff]  ;;  %v597_v25 = vld [vmem:[%s1104_s0 + $0x90] sm:$0xf] }
   0x8   :  { %459 = vmatpush.bf16.msra.mxu2 %v818_v5  ;;  %v740_v20 = vld [vmem:[%s1103_s1 + $0x48] sm:$0xff]  ;;  %v739_v22 = vld [vmem:[%s1103_s1 + $0x40] sm:$0xff]  ;;  %v726_v26 = vld [vmem:[%s1104_s0 + $0x98] sm:$0xf0] }
   0x9   :  { %v525_v23 = vld [vmem:[%s1104_s0] sm:$0xf]  ;;  %v708_v24 = vld [vmem:[%s1104_s0 + $0x8] sm:$0xf0]  ;;  %v707_v27 = vld [vmem:[%s1104_s0 + $0x4] sm:$0xf]  ;;  %v598_v32 = vor.u32 %v726_v26, %v597_v25 }
   0xa   :  { %358 = vmatpush.bf16.msra.mxu0 %v736_v6  ;;  %753 = vmatpush.bf16.msra.mxu3 %v736_v6  ;;  %v527_v28 = vld [vmem:[%s1104_s0 + $0xc] sm:$0xf0]  ;;  %v545_v29 = vld [vmem:[%s1104_s0 + $0x20] sm:$0xf]  ;;  %v712_v30 = vld [vmem:[%s1104_s0 + $0x28] sm:$0xf0]  ;;  %v526_v31 = vor.u32 %v708_v24, %v525_v23 }
   0xb   :  { %407 = vmatpush.bf16.msra.mxu1 %v744_v7  ;;  %v530_v33 = vor.u32 %v707_v27, %v527_v28  ;;  %v546_v34 = vor.u32 %v712_v30, %v545_v29  ;;  %v537_v35 = vld [vmem:[%s1104_s0 + $0x18] sm:$0xf]  ;;  %v711_v36 = vld [vmem:[%s1104_s0 + $0x20] sm:$0xf0]  ;;  %v609_v37 = vld [vmem:[%s1104_s0 + $0xa8] sm:$0xf] }
   0xc   :  { %460 = vmatpush.bf16.msra.mxu2 %v831_v8  ;;  %v729_v38 = vld [vmem:[%s1104_s0 + $0xb0] sm:$0xf0]  ;;  %v710_v39 = vld [vmem:[%s1104_s0 + $0x1c] sm:$0xf]  ;;  %v539_v40 = vld [vmem:[%s1104_s0 + $0x24] sm:$0xf0]  ;;  %v538_v43 = vor.u32 %v711_v36, %v537_v35 }
   0xd   :  { %v557_v41 = vld [vmem:[%s1104_s0 + $0x38] sm:$0xf]  ;;  %v715_v42 = vld [vmem:[%s1104_s0 + $0x40] sm:$0xf0]  ;;  %v610_v44 = vor.u32 %v729_v38, %v609_v37  ;;  %v542_v45 = vor.u32 %v710_v39, %v539_v40  ;;  %v549_v47 = vld [vmem:[%s1104_s0 + $0x30] sm:$0xf] }
   0xe   :  { %359 = vmatpush.bf16.msra.mxu0 %v735_v9  ;;  %754 = vmatpush.bf16.msra.mxu3 %v735_v9  ;;  %v558_v46 = vor.u32 %v715_v42, %v557_v41  ;;  %v714_v48 = vld [vmem:[%s1104_s0 + $0x38] sm:$0xf0]  ;;  %v713_v49 = vld [vmem:[%s1104_s0 + $0x34] sm:$0xf]  ;;  %v551_v50 = vld [vmem:[%s1104_s0 + $0x3c] sm:$0xf0] }
   0xf   :  { %408 = vmatpush.bf16.msra.mxu1 %v743_v10  ;;  %v725_v51 = vld [vmem:[%s1104_s0 + $0x94] sm:$0xf]  ;;  %v599_v52 = vld [vmem:[%s1104_s0 + $0x9c] sm:$0xf0]  ;;  %v569_v53 = vld [vmem:[%s1104_s0 + $0x50] sm:$0xf]  ;;  %v550_v55 = vor.u32 %v714_v48, %v549_v47  ;;  %v554_v56 = vor.u32 %v713_v49, %v551_v50 }
  0x10   :  { %461 = vmatpush.bf16.msra.mxu2 %v843_v11  ;;  %v718_v54 = vld [vmem:[%s1104_s0 + $0x58] sm:$0xf0]  ;;  %v602_v57 = vor.u32 %v725_v51, %v599_v52  ;;  %v561_v59 = vld [vmem:[%s1104_s0 + $0x48] sm:$0xf]  ;;  %v717_v60 = vld [vmem:[%s1104_s0 + $0x50] sm:$0xf0] }
  0x11   :  { %v570_v58 = vor.u32 %v718_v54, %v569_v53  ;;  %v716_v61 = vld [vmem:[%s1104_s0 + $0x4c] sm:$0xf]  ;;  %v563_v62 = vld [vmem:[%s1104_s0 + $0x54] sm:$0xf0]  ;;  %v562_v3 = vor.u32 %v717_v60, %v561_v59  ;;  %v719_v9 = vld [vmem:[%s1104_s0 + $0x64] sm:$0xf] }
  0x12   :  { %360 = vmatpush.bf16.msra.mxu0 %v734_v15  ;;  %755 = vmatpush.bf16.msra.mxu3 %v734_v15  ;;  %v728_v63 = vld [vmem:[%s1104_s0 + $0xac] sm:$0xf]  ;;  %v611_v0 = vld [vmem:[%s1104_s0 + $0xb4] sm:$0xf0]  ;;  %v730_v12 = vld [vmem:[%s1104_s0 + $0xb8] sm:$0xf0] }
  0x13   :  { %699 = vmatmul.msk.bf16.vlgmr.msra.gmra.mxu2 %vm331_vm0, %v534_v14  ;;  %409 = vmatpush.bf16.msra.mxu1 %v742_v16  ;;  %v593_v13 = vld [vmem:[%s1104_s0 + $0x80] sm:$0xf]  ;;  %v724_v14 = vld [vmem:[%s1104_s0 + $0x88] sm:$0xf0]  ;;  %v605_v23 = vld [vmem:[%s1104_s0 + $0x98] sm:$0xf] }
  0x14   :  { %v727_v24 = vld [vmem:[%s1104_s0 + $0xa0] sm:$0xf0]  ;;  %v1031_v29 = vld [vmem:[%s1105_s2] ss:$0 sm:$0xff] }
  0x15   :  { %v606_v27 = vor.u32 %v727_v24, %v605_v23 }
  0x16   :  { %361 = vmatpush.bf16.msra.mxu0 %v733_v17  ;;  %756 = vmatpush.bf16.msra.mxu3 %v733_v17 }
  0x17   :  { %410 = vmatpush.bf16.msra.mxu1 %v741_v18 }
  0x1a   :  { %362 = vmatpush.bf16.msra.mxu0 %v732_v19  ;;  %757 = vmatpush.bf16.msra.mxu3 %v732_v19  ;;  %v585_v19 = vld [vmem:[%s1104_s0 + $0x78] sm:$0xf] }
  0x1b   :  { %411 = vmatpush.bf16.msra.mxu1 %v740_v20 }
  0x1e   :  { %363 = vmatpush.bf16.msra.mxu0 %v731_v21  ;;  %758 = vmatpush.bf16.msra.mxu3 %v731_v21  ;;  %v722_v21 = vld [vmem:[%s1104_s0 + $0x7c] sm:$0xf] }
  0x1f   :  { %412 = vmatpush.bf16.msra.mxu1 %v739_v22 }
  0x21   :  { %364 = vmatmul.bf16.vlgmr.msra.gmra.mxu0 %v526_v31  ;;  %394 = vmatmul.bf16.vlgmr.msra.gmra.mxu3 %v598_v32 }
  0x22   :  { %759 = vmatpush.bf16.msrb.mxu3 %v798_v1  ;;  %413 = vmatmul.bf16.vlgmr.msra.gmra.mxu1 %v530_v33  ;;  %v581_v1 = vld [vmem:[%s1104_s0 + $0x68] sm:$0xf] }
  0x23   :  { %700 = vmatmul.msk.bf16.gmra.mxu2 %vm331_vm0, %v546_v34 }
  0x26   :  { %760 = vmatpush.bf16.msrb.mxu3 %v813_v4  ;;  %v566_v4 = vor.u32 %v716_v61, %v563_v62 }
  0x2a   :  { %761 = vmatpush.bf16.msrb.mxu3 %v744_v7  ;;  %v573_v7 = vld [vmem:[%s1104_s0 + $0x60] sm:$0xf] }
  0x2e   :  { %762 = vmatpush.bf16.msrb.mxu3 %v743_v10  ;;  %v575_v10 = vld [vmem:[%s1104_s0 + $0x6c] sm:$0xf0] }
  0x31   :  { %369 = vmatmul.bf16.gmra.mxu0 %v538_v43  ;;  %399 = vmatmul.bf16.gmra.mxu3 %v610_v44 }
  0x32   :  { %763 = vmatpush.bf16.msrb.mxu3 %v742_v16  ;;  %418 = vmatmul.bf16.gmra.mxu1 %v542_v45  ;;  %v578_v16 = vor.u32 %v719_v9, %v575_v10 }
  0x33   :  { %701 = vmatmul.msk.bf16.gmra.mxu2 %vm331_vm0, %v558_v46 }
  0x36   :  { %764 = vmatpush.bf16.msrb.mxu3 %v741_v18  ;;  %v594_v18 = vor.u32 %v724_v14, %v593_v13 }
  0x3a   :  { %765 = vmatpush.bf16.msrb.mxu3 %v740_v20  ;;  %v723_v20 = vld [vmem:[%s1104_s0 + $0x80] sm:$0xf0] }
  0x3b   :  { %v586_v25 = vor.u32 %v723_v20, %v585_v19 }
  0x3e   :  { %766 = vmatpush.bf16.msrb.mxu3 %v739_v22  ;;  %v587_v22 = vld [vmem:[%s1104_s0 + $0x84] sm:$0xf0] }
  0x3f   :  { %v590_v26 = vor.u32 %v722_v21, %v587_v22 }
  0x41   :  { %374 = vmatmul.bf16.gmra.mxu0 %v550_v55  ;;  %443 = vmatmul.bf16.vlgmr.msrb.gmra.mxu3 %v602_v57 }
  0x42   :  { %767 = vmatpush.bf16.msra.mxu3 %v803_v2  ;;  %423 = vmatmul.bf16.gmra.mxu1 %v554_v56  ;;  %v721_v2 = vld [vmem:[%s1104_s0 + $0x70] sm:$0xf0] }
  0x43   :  { %702 = vmatmul.msk.bf16.gmra.mxu2 %vm331_vm0, %v570_v58  ;;  %v582_v6 = vor.u32 %v721_v2, %v581_v1 }
  0x46   :  { %768 = vmatpush.bf16.msra.mxu3 %v818_v5  ;;  %v614_v5 = vor.u32 %v728_v63, %v611_v0 }
  0x4a   :  { %769 = vmatpush.bf16.msra.mxu3 %v831_v8  ;;  %v720_v8 = vld [vmem:[%s1104_s0 + $0x68] sm:$0xf0] }
  0x4b   :  { %v574_v15 = vor.u32 %v720_v8, %v573_v7 }
  0x4e   :  { %770 = vmatpush.bf16.msra.mxu3 %v843_v11  ;;  %v617_v11 = vld [vmem:[%s1104_s0 + $0xb0] sm:$0xf] }
  0x4f   :  { %v618_v17 = vor.u32 %v730_v12, %v617_v11 }
  0x51   :  { %379 = vmatmul.bf16.gmra.mxu0 %v562_v3  ;;  %448 = vmatmul.bf16.gmra.mxu3 %v614_v5 }
  0x52   :  { %428 = vmatmul.bf16.gmra.mxu1 %v566_v4 }
  0x53   :  { %703 = vmatmul.msk.bf16.gmra.mxu2 %vm331_vm0, %v582_v6 }
  0x61   :  { %384 = vmatmul.bf16.gmra.mxu0 %v574_v15  ;;  %706 = vmatmul.msk.bf16.vlgmr.msra.gmra.mxu3 %vm331_vm0, %v618_v17 }
  0x62   :  { %433 = vmatmul.bf16.gmra.mxu1 %v578_v16 }
  0x63   :  { %704 = vmatmul.msk.bf16.gmra.mxu2 %vm331_vm0, %v594_v18 }
  0x71   :  { %389 = vmatmul.bf16.gmra.mxu0 %v586_v25 }
  0x72   :  { %438 = vmatmul.bf16.gmra.mxu1 %v590_v26 }
  0x73   :  { %705 = vmatmul.msk.bf16.gmra.mxu2 %vm331_vm0, %v606_v27 }
  0x96   :  { %v463_v28 = vpop.f32.mrf.mxu2 }
  0x9e   :  { %v465_v30 = vpop.f32.mrf.mxu2  ;;  %v365_v31 = vpop.f32.mrf.mxu0 }
  0x9f   :  { %v366_v32 = vadd.f32 %v1031_v29, %v365_v31  ;;  %v414_v33 = vpop.f32.mrf.mxu1 }
  0xa1   :  { %v415_v34 = vadd.f32 %v414_v33, %v366_v32 }
  0xa3   :  { %v464_v35 = vadd.f32 %v463_v28, %v415_v34 }
  0xa4   :  { %v1037_v36 = vpop.f32.mrf.mxu3 }
  0xa5   :  { %503 = vst [vmem:[%s1106_s3] sm:$0xff] %v464_v35 }
  0xa6   :  { %v468_v37 = vpop.f32.mrf.mxu2  ;;  %v367_v38 = vpop.f32.mrf.mxu0 }
  0xa7   :  { %v368_v39 = vadd.f32 %v1031_v29, %v367_v38  ;;  %v416_v40 = vpop.f32.mrf.mxu1 }
  0xa9   :  { %v417_v41 = vadd.f32 %v416_v40, %v368_v39 }
  0xab   :  { %v466_v42 = vadd.f32 %v465_v30, %v417_v41 }
  0xac   :  { %v1043_v43 = vpop.f32.mrf.mxu3 }
  0xad   :  { %504 = vst [vmem:[%s1106_s3 + $0x8] sm:$0xff] %v466_v42 }
  0xae   :  { %v470_v44 = vpop.f32.mrf.mxu2  ;;  %v370_v45 = vpop.f32.mrf.mxu0 }
  0xaf   :  { %v371_v46 = vadd.f32 %v1031_v29, %v370_v45  ;;  %v419_v47 = vpop.f32.mrf.mxu1 }
  0xb1   :  { %v420_v48 = vadd.f32 %v419_v47, %v371_v46 }
  0xb3   :  { %v469_v49 = vadd.f32 %v468_v37, %v420_v48 }
  0xb4   :  { %v400_v50 = vpop.f32.mrf.mxu3 }
  0xb5   :  { %505 = vst [vmem:[%s1106_s3 + $0x10] sm:$0xff] %v469_v49  ;;  %v401_v27 = vadd.f32 %v1031_v29, %v400_v50  ;;  %v396_v50 = vadd.f32 %v1031_v29, %v1037_v36  ;;  %v398_v36 = vadd.f32 %v1031_v29, %v1043_v43 }
  0xb6   :  { %v473_v51 = vpop.f32.mrf.mxu2  ;;  %v372_v52 = vpop.f32.mrf.mxu0 }
  0xb7   :  { %v373_v53 = vadd.f32 %v1031_v29, %v372_v52  ;;  %v421_v54 = vpop.f32.mrf.mxu1 }
  0xb9   :  { %v422_v55 = vadd.f32 %v421_v54, %v373_v53 }
  0xbb   :  { %v471_v56 = vadd.f32 %v470_v44, %v422_v55 }
  0xbc   :  { %v402_v57 = vpop.f32.mrf.mxu3 }
  0xbd   :  { %506 = vst [vmem:[%s1106_s3 + $0x18] sm:$0xff] %v471_v56  ;;  %v403_v39 = vadd.f32 %v1031_v29, %v402_v57 }
  0xbe   :  { %v475_v58 = vpop.f32.mrf.mxu2  ;;  %v375_v59 = vpop.f32.mrf.mxu0 }
  0xbf   :  { %v376_v60 = vadd.f32 %v1031_v29, %v375_v59  ;;  %v424_v61 = vpop.f32.mrf.mxu1 }
  0xc1   :  { %v425_v62 = vadd.f32 %v424_v61, %v376_v60 }
  0xc3   :  { %v474_v63 = vadd.f32 %v473_v51, %v425_v62 }
  0xc4   :  { %v444_v0 = vpop.f32.mrf.mxu3 }
  0xc5   :  { %507 = vst [vmem:[%s1106_s3 + $0x20] sm:$0xff] %v474_v63  ;;  %v445_v52 = vadd.f32 %v444_v0, %v396_v50 }
  0xc6   :  { %v478_v1 = vpop.f32.mrf.mxu2  ;;  %v377_v2 = vpop.f32.mrf.mxu0 }
  0xc7   :  { %v378_v3 = vadd.f32 %v1031_v29, %v377_v2  ;;  %v426_v4 = vpop.f32.mrf.mxu1 }
  0xc9   :  { %v427_v5 = vadd.f32 %v426_v4, %v378_v3 }
  0xcb   :  { %v476_v6 = vadd.f32 %v475_v58, %v427_v5 }
  0xcc   :  { %v446_v7 = vpop.f32.mrf.mxu3 }
  0xcd   :  { %508 = vst [vmem:[%s1106_s3 + $0x28] sm:$0xff] %v476_v6  ;;  %v447_v60 = vadd.f32 %v446_v7, %v398_v36 }
  0xce   :  { %v480_v8 = vpop.f32.mrf.mxu2  ;;  %v380_v9 = vpop.f32.mrf.mxu0 }
  0xcf   :  { %v381_v10 = vadd.f32 %v1031_v29, %v380_v9  ;;  %v429_v11 = vpop.f32.mrf.mxu1 }
  0xd1   :  { %v430_v12 = vadd.f32 %v429_v11, %v381_v10 }
  0xd3   :  { %v479_v13 = vadd.f32 %v478_v1, %v430_v12 }
  0xd4   :  { %v449_v14 = vpop.f32.mrf.mxu3 }
  0xd5   :  { %509 = vst [vmem:[%s1106_s3 + $0x30] sm:$0xff] %v479_v13  ;;  %v450_v30 = vadd.f32 %v449_v14, %v401_v27 }
  0xd6   :  { %v483_v15 = vpop.f32.mrf.mxu2  ;;  %v382_v16 = vpop.f32.mrf.mxu0 }
  0xd7   :  { %v383_v17 = vadd.f32 %v1031_v29, %v382_v16  ;;  %v431_v18 = vpop.f32.mrf.mxu1 }
  0xd9   :  { %v432_v19 = vadd.f32 %v431_v18, %v383_v17 }
  0xdb   :  { %v481_v20 = vadd.f32 %v480_v8, %v432_v19 }
  0xdc   :  { %v451_v21 = vpop.f32.mrf.mxu3 }
  0xdd   :  { %510 = vst [vmem:[%s1106_s3 + $0x38] sm:$0xff] %v481_v20  ;;  %v452_v41 = vadd.f32 %v451_v21, %v403_v39 }
  0xde   :  { %v485_v22 = vpop.f32.mrf.mxu2  ;;  %v385_v23 = vpop.f32.mrf.mxu0 }
  0xdf   :  { %v386_v24 = vadd.f32 %v1031_v29, %v385_v23  ;;  %v434_v25 = vpop.f32.mrf.mxu1 }
  0xe1   :  { %v435_v26 = vadd.f32 %v434_v25, %v386_v24 }
  0xe3   :  { %v484_v28 = vadd.f32 %v483_v15, %v435_v26 }
  0xe4   :  { %v498_v31 = vpop.f32.mrf.mxu3 }
  0xe5   :  { %511 = vst [vmem:[%s1106_s3 + $0x40] sm:$0xff] %v484_v28  ;;  %v499_v33 = vadd.f32 %v498_v31, %v450_v30 }
  0xe6   :  { %v488_v32 = vpop.f32.mrf.mxu2  ;;  %v387_v34 = vpop.f32.mrf.mxu0 }
  0xe7   :  { %v388_v35 = vadd.f32 %v1031_v29, %v387_v34  ;;  %v436_v37 = vpop.f32.mrf.mxu1  ;;  %517 = vst [vmem:[%s1106_s3 + $0x70] sm:$0xff] %v499_v33 }
  0xe9   :  { %v437_v38 = vadd.f32 %v436_v37, %v388_v35 }
  0xeb   :  { %v486_v40 = vadd.f32 %v485_v22, %v437_v38 }
  0xec   :  { %v500_v42 = vpop.f32.mrf.mxu3 }
  0xed   :  { %512 = vst [vmem:[%s1106_s3 + $0x48] sm:$0xff] %v486_v40  ;;  %v501_v45 = vadd.f32 %v500_v42, %v452_v41 }
  0xee   :  { %v490_v44 = vpop.f32.mrf.mxu2  ;;  %v390_v46 = vpop.f32.mrf.mxu0 }
  0xef   :  { %v391_v47 = vadd.f32 %v1031_v29, %v390_v46  ;;  %v439_v48 = vpop.f32.mrf.mxu1  ;;  %518 = vst [vmem:[%s1106_s3 + $0x78] sm:$0xff] %v501_v45 }
  0xf1   :  { %v440_v49 = vadd.f32 %v439_v48, %v391_v47 }
  0xf3   :  { %v489_v51 = vadd.f32 %v488_v32, %v440_v49 }
  0xf5   :  { %513 = vst [vmem:[%s1106_s3 + $0x50] sm:$0xff] %v489_v51 }
  0xf6   :  { %v493_v53 = vpop.f32.mrf.mxu2  ;;  %v392_v54 = vpop.f32.mrf.mxu0 }
  0xf7   :  { %v494_v55 = vadd.f32 %v493_v53, %v445_v52  ;;  %v393_v56 = vadd.f32 %v1031_v29, %v392_v54  ;;  %v441_v57 = vpop.f32.mrf.mxu1 }
  0xf9   :  { %515 = vst [vmem:[%s1106_s3 + $0x60] sm:$0xff] %v494_v55  ;;  %v442_v58 = vadd.f32 %v441_v57, %v393_v56 }
  0xfb   :  { %v491_v59 = vadd.f32 %v490_v44, %v442_v58 }
  0xfd   :  { %514 = vst [vmem:[%s1106_s3 + $0x58] sm:$0xff] %v491_v59 }
  0xfe   :  { %v495_v61 = vpop.f32.mrf.mxu2 }
  0xff   :  { %v496_v62 = vadd.f32 %v495_v61, %v447_v60 }
 0x101   :  { %516 = vst [vmem:[%s1106_s3 + $0x68] sm:$0xff] %v496_v62 }

</bundles_post_ra>
